<compile_context>
chip_gen: v7x
topology: tpu7x:2x2x1
jax: 0.10.0
libtpu: 0.0.40
codegen_flags: <defaults>
</compile_context>

<pallas_src>
import functools

import jax
import jax.numpy as jnp
from jax.experimental import pallas as pl
from jax.experimental.pallas import tpu as pltpu


def _round_up(x, m):
    return ((x + m - 1) // m) * m


# Logical / padded layer widths.
D_IN = 784
H1, H2, N_OUT = 280, 560, 10
H1P, H2P, N_OUTP = 384, 640, 128        # zero-padded to 128 multiples

# Below this many (16-rounded) rows, don't bother splitting the batch across
# two TensorCores (single grid step instead).
_MIN_SPLIT_ROWS = 256


def mlp_kernel(x_ref, w1_ref, b1_ref, w2_ref, b2_ref, w3_ref, b3_ref, o_ref):
    # Cast the streamed x tile to bf16 in-kernel (saves a standalone XLA pass).
    x = x_ref[...].astype(jnp.bfloat16)
    # fc1 + ReLU   (bf16 inputs, f32 accumulate on MXU, bias add + ReLU in f32)
    h1 = jnp.dot(x, w1_ref[...], preferred_element_type=jnp.float32)
    h1 = jnp.maximum(h1 + b1_ref[...], 0.0).astype(jnp.bfloat16)
    # fc2 + ReLU
    h2 = jnp.dot(h1, w2_ref[...], preferred_element_type=jnp.float32)
    h2 = jnp.maximum(h2 + b2_ref[...], 0.0).astype(jnp.bfloat16)
    # fc3 (no activation); output columns are 128-padded (lane-dense store).
    out = jnp.dot(h2, w3_ref[...], preferred_element_type=jnp.float32)
    o_ref[...] = (out + b3_ref[...]).astype(o_ref.dtype)


def prepare_params(params):
    """One-time param prep: bf16 weights, zero-pad hidden/output dims to 128
    multiples. Zero pads are exact (ReLU(0)=0, zero rows/cols contribute 0),
    so the forward math is unchanged."""
    w1, b1, w2, b2, w3, b3 = params
    cd = jnp.bfloat16
    w1p = jnp.pad(w1, ((0, 0), (0, H1P - H1))).astype(cd)            # (784, 384)
    b1p = jnp.pad(b1, ((0, 0), (0, H1P - H1)))                       # (1, 384) f32
    w2p = jnp.pad(w2, ((0, H1P - H1), (0, H2P - H2))).astype(cd)     # (384, 640)
    b2p = jnp.pad(b2, ((0, 0), (0, H2P - H2)))                       # (1, 640) f32
    w3p = jnp.pad(w3, ((0, H2P - H2), (0, N_OUTP - N_OUT))).astype(cd)  # (640, 128)
    b3p = jnp.pad(b3, ((0, 0), (0, N_OUTP - N_OUT)))                 # (1, 128) f32
    return (w1p, b1p, w2p, b2p, w3p, b3p)


@functools.partial(jax.jit, static_argnames=("tile_m",))
def model_5_forward(x, prepared_params, *, tile_m=1024):
    """x: (B, 1, 28, 28) float32 (NCHW). prepared_params: from prepare_params().
    Returns (B, 10) float32 logits."""
    w1, b1, w2, b2, w3, b3 = prepared_params

    B = x.shape[0]
    x2d = x.reshape(B, -1)                 # free reshape (contiguous), stays f32
    d_in = x2d.shape[1]

    # Batch tiling: 16-row granularity (bf16 sublane packing). Keep >= 2 grid
    # steps when the batch is large enough so the "parallel" axis actually
    # shards across v7x's two TensorCores.
    b16 = _round_up(B, 16)
    if b16 >= 2 * _MIN_SPLIT_ROWS:
        tm = min(tile_m, _round_up((b16 + 1) // 2, 16))
    else:
        tm = min(tile_m, b16)
    b_pad = _round_up(B, tm)
    if b_pad != B:
        x2d = jnp.pad(x2d, ((0, b_pad - B), (0, 0)))   # padded rows sliced off below

    out = pl.pallas_call(
        mlp_kernel,
        out_shape=jax.ShapeDtypeStruct((b_pad, N_OUTP), jnp.float32),
        grid=(b_pad // tm,),
        in_specs=[
            pl.BlockSpec((tm, d_in), lambda i: (i, 0)),       # streamed x tile (f32)
            pl.BlockSpec(w1.shape, lambda i: (0, 0)),         # resident weights
            pl.BlockSpec(b1.shape, lambda i: (0, 0)),
            pl.BlockSpec(w2.shape, lambda i: (0, 0)),
            pl.BlockSpec(b2.shape, lambda i: (0, 0)),
            pl.BlockSpec(w3.shape, lambda i: (0, 0)),
            pl.BlockSpec(b3.shape, lambda i: (0, 0)),
        ],
        out_specs=pl.BlockSpec((tm, N_OUTP), lambda i: (i, 0)),
        compiler_params=pltpu.CompilerParams(
            dimension_semantics=("parallel",),                # shard batch across TCs
            vmem_limit_bytes=48 * 1024 * 1024,                # headroom for v7x 64 MiB
        ),
    )(x2d, w1, b1, w2, b2, w3, b3)

    return out[:B, :N_OUT]


def init_params(key):
    """Deterministic init mimicking nn.Linear shapes.

    PyTorch Linear stores weight as (out, in); we store the transpose
    (in, out) so the kernel computes x @ W + b directly.
    Biases are kept 2-D (1, out) for TPU-friendly layout/broadcast.
    """
    dims = [(D_IN, H1), (H1, H2), (H2, N_OUT)]
    params = []
    for fan_in, fan_out in dims:
        kw, kb, key = jax.random.split(key, 3)
        bound = 1.0 / jnp.sqrt(fan_in)
        w = jax.random.uniform(kw, (fan_in, fan_out), jnp.float32, -bound, bound)
        b = jax.random.uniform(kb, (1, fan_out), jnp.float32, -bound, bound)
        params += [w, b]
    return tuple(params)


def reference_forward_f32(x, params):
    """Pure-f32 reference (matches the original torch module's math)."""
    w1, b1, w2, b2, w3, b3 = params
    h = x.reshape(x.shape[0], -1)
    h = jnp.maximum(h @ w1 + b1, 0.0)
    h = jnp.maximum(h @ w2 + b2, 0.0)
    return h @ w3 + b3


def reference_forward_bf16(x, params):
    """Reference mirroring the kernel's bf16-input / f32-accumulate numerics."""
    w1, b1, w2, b2, w3, b3 = params
    cd = jnp.bfloat16
    h = x.reshape(x.shape[0], -1).astype(cd)
    h = jnp.dot(h, w1.astype(cd), preferred_element_type=jnp.float32) + b1
    h = jnp.maximum(h, 0.0).astype(cd)
    h = jnp.dot(h, w2.astype(cd), preferred_element_type=jnp.float32) + b2
    h = jnp.maximum(h, 0.0).astype(cd)
    return jnp.dot(h, w3.astype(cd), preferred_element_type=jnp.float32) + b3


if __name__ == "__main__":
    key = jax.random.PRNGKey(0)
    kx, kp = jax.random.split(key)
    params = init_params(kp)
    prepared = prepare_params(params)   # one-time pad/cast, outside the hot path

    # Small MNIST-like batch: (B=8, C=1, H=28, W=28) -> flattened to 784 features.
    # (At B=8 the call is launch/weight-DMA bound; the tiling pays off at large B.)
    x = jax.random.normal(kx, (8, 1, 28, 28), jnp.float32)

    out = model_5_forward(x, prepared)
    out = jax.block_until_ready(out)
    assert out.shape == (8, 10), out.shape

    # Tight check vs a reference with identical bf16/f32-accumulate numerics.
    ref_bf16 = reference_forward_bf16(x, params)
    assert jnp.allclose(out, ref_bf16, atol=2e-3, rtol=2e-3), "mismatch vs bf16 reference"

    # Loose sanity check vs the pure-f32 torch-equivalent math (bf16 rounding only).
    ref_f32 = reference_forward_f32(x, params)
    assert jnp.allclose(out, ref_f32, atol=5e-2, rtol=5e-2), "mismatch vs f32 reference"

    print("KERNEL_OK")
</pallas_src>

<mosaic_0001>
module attributes {stable_mosaic.version = 11 : i64} {
  func.func @mlp_kernel(%arg0: i32, %arg1: memref<16x784xf32, #tpu.memory_space<vmem>>, %arg2: memref<784x384xbf16, #tpu.memory_space<vmem>>, %arg3: memref<1x384xf32, #tpu.memory_space<vmem>>, %arg4: memref<384x640xbf16, #tpu.memory_space<vmem>>, %arg5: memref<1x640xf32, #tpu.memory_space<vmem>>, %arg6: memref<640x128xbf16, #tpu.memory_space<vmem>>, %arg7: memref<1x128xf32, #tpu.memory_space<vmem>>, %arg8: memref<16x128xf32, #tpu.memory_space<vmem>>) attributes {dimension_semantics = [#tpu.dimension_semantics<parallel>], iteration_bounds = array<i64: 1>, scalar_prefetch = 0 : i64, scratch_operands = 0 : i64, tpu.core_type = #tpu.core_type<tc>, window_params = [{transform_indices = @transform_0, window_bounds = array<i64: 16, 784>}, {pipeline_mode = #tpu.pipeline_mode<synchronous>, transform_indices = @transform_1, window_bounds = array<i64: 784, 384>}, {pipeline_mode = #tpu.pipeline_mode<synchronous>, transform_indices = @transform_2, window_bounds = array<i64: 1, 384>}, {pipeline_mode = #tpu.pipeline_mode<synchronous>, transform_indices = @transform_3, window_bounds = array<i64: 384, 640>}, {pipeline_mode = #tpu.pipeline_mode<synchronous>, transform_indices = @transform_4, window_bounds = array<i64: 1, 640>}, {pipeline_mode = #tpu.pipeline_mode<synchronous>, transform_indices = @transform_5, window_bounds = array<i64: 640, 128>}, {pipeline_mode = #tpu.pipeline_mode<synchronous>, transform_indices = @transform_6, window_bounds = array<i64: 1, 128>}, {transform_indices = @transform_7, window_bounds = array<i64: 16, 128>}]} {
    %c0 = arith.constant 0 : index
    %c0_0 = arith.constant 0 : index
    %0 = vector.load %arg1[%c0, %c0_0] : memref<16x784xf32, #tpu.memory_space<vmem>>, vector<16x784xf32>
    %1 = arith.truncf %0 : vector<16x784xf32> to vector<16x784xbf16>
    %c0_1 = arith.constant 0 : index
    %c0_2 = arith.constant 0 : index
    %2 = vector.load %arg2[%c0_1, %c0_2] : memref<784x384xbf16, #tpu.memory_space<vmem>>, vector<784x384xbf16>
    %cst = arith.constant dense<0.000000e+00> : vector<16x384xf32>
    %3 = tpu.matmul %1, %2, %cst {dimension_numbers = #tpu.dot_dimension_numbers<[1], [0], [0], [1], [0, 0, 1, 1], [], []>} : vector<16x784xbf16>, vector<784x384xbf16>, vector<16x384xf32> -> vector<16x384xf32>
    %c0_3 = arith.constant 0 : index
    %c0_4 = arith.constant 0 : index
    %4 = vector.load %arg3[%c0_3, %c0_4] : memref<1x384xf32, #tpu.memory_space<vmem>>, vector<1x384xf32>
    %5 = vector.broadcast %4 : vector<1x384xf32> to vector<16x384xf32>
    %6 = arith.addf %3, %5 : vector<16x384xf32>
    %cst_5 = arith.constant 0.000000e+00 : f32
    %7 = vector.broadcast %cst_5 : f32 to vector<16x384xf32>
    %8 = arith.maximumf %6, %7 : vector<16x384xf32>
    %9 = arith.truncf %8 : vector<16x384xf32> to vector<16x384xbf16>
    %c0_6 = arith.constant 0 : index
    %c0_7 = arith.constant 0 : index
    %10 = vector.load %arg4[%c0_6, %c0_7] : memref<384x640xbf16, #tpu.memory_space<vmem>>, vector<384x640xbf16>
    %cst_8 = arith.constant dense<0.000000e+00> : vector<16x640xf32>
    %11 = tpu.matmul %9, %10, %cst_8 {dimension_numbers = #tpu.dot_dimension_numbers<[1], [0], [0], [1], [0, 0, 1, 1], [], []>} : vector<16x384xbf16>, vector<384x640xbf16>, vector<16x640xf32> -> vector<16x640xf32>
    %c0_9 = arith.constant 0 : index
    %c0_10 = arith.constant 0 : index
    %12 = vector.load %arg5[%c0_9, %c0_10] : memref<1x640xf32, #tpu.memory_space<vmem>>, vector<1x640xf32>
    %13 = vector.broadcast %12 : vector<1x640xf32> to vector<16x640xf32>
    %14 = arith.addf %11, %13 : vector<16x640xf32>
    %cst_11 = arith.constant 0.000000e+00 : f32
    %15 = vector.broadcast %cst_11 : f32 to vector<16x640xf32>
    %16 = arith.maximumf %14, %15 : vector<16x640xf32>
    %17 = arith.truncf %16 : vector<16x640xf32> to vector<16x640xbf16>
    %c0_12 = arith.constant 0 : index
    %c0_13 = arith.constant 0 : index
    %18 = vector.load %arg6[%c0_12, %c0_13] : memref<640x128xbf16, #tpu.memory_space<vmem>>, vector<640x128xbf16>
    %cst_14 = arith.constant dense<0.000000e+00> : vector<16x128xf32>
    %19 = tpu.matmul %17, %18, %cst_14 {dimension_numbers = #tpu.dot_dimension_numbers<[1], [0], [0], [1], [0, 0, 1, 1], [], []>} : vector<16x640xbf16>, vector<640x128xbf16>, vector<16x128xf32> -> vector<16x128xf32>
    %c0_15 = arith.constant 0 : index
    %c0_16 = arith.constant 0 : index
    %20 = vector.load %arg7[%c0_15, %c0_16] : memref<1x128xf32, #tpu.memory_space<vmem>>, vector<1x128xf32>
    %21 = vector.broadcast %20 : vector<1x128xf32> to vector<16x128xf32>
    %22 = arith.addf %19, %21 : vector<16x128xf32>
    %c0_17 = arith.constant 0 : index
    %c0_18 = arith.constant 0 : index
    %23 = vector.load %arg8[%c0_17, %c0_18] : memref<16x128xf32, #tpu.memory_space<vmem>>, vector<16x128xf32>
    tpu.vector_store %arg8[%c0_17, %c0_18], %22 {strides = array<i32>} : memref<16x128xf32, #tpu.memory_space<vmem>>, vector<16x128xf32>,
    return
  }
  func.func @transform_0(%arg0: i32) -> (i32, i32) {
    %c0_i32 = arith.constant 0 : i32
    %c0_i32_0 = arith.constant 0 : i32
    return %arg0, %c0_i32 : i32, i32
  }
  func.func @transform_1(%arg0: i32) -> (i32, i32) {
    %c0_i32 = arith.constant 0 : i32
    %c0_i32_0 = arith.constant 0 : i32
    %c0_i32_1 = arith.constant 0 : i32
    return %c0_i32, %c0_i32_0 : i32, i32
  }
  func.func @transform_2(%arg0: i32) -> (i32, i32) {
    %c0_i32 = arith.constant 0 : i32
    %c0_i32_0 = arith.constant 0 : i32
    %c0_i32_1 = arith.constant 0 : i32
    return %c0_i32, %c0_i32_0 : i32, i32
  }
  func.func @transform_3(%arg0: i32) -> (i32, i32) {
    %c0_i32 = arith.constant 0 : i32
    %c0_i32_0 = arith.constant 0 : i32
    %c0_i32_1 = arith.constant 0 : i32
    return %c0_i32, %c0_i32_0 : i32, i32
  }
  func.func @transform_4(%arg0: i32) -> (i32, i32) {
    %c0_i32 = arith.constant 0 : i32
    %c0_i32_0 = arith.constant 0 : i32
    %c0_i32_1 = arith.constant 0 : i32
    return %c0_i32, %c0_i32_0 : i32, i32
  }
  func.func @transform_5(%arg0: i32) -> (i32, i32) {
    %c0_i32 = arith.constant 0 : i32
    %c0_i32_0 = arith.constant 0 : i32
    %c0_i32_1 = arith.constant 0 : i32
    return %c0_i32, %c0_i32_0 : i32, i32
  }
  func.func @transform_6(%arg0: i32) -> (i32, i32) {
    %c0_i32 = arith.constant 0 : i32
    %c0_i32_0 = arith.constant 0 : i32
    %c0_i32_1 = arith.constant 0 : i32
    return %c0_i32, %c0_i32_0 : i32, i32
  }
  func.func @transform_7(%arg0: i32) -> (i32, i32) {
    %c0_i32 = arith.constant 0 : i32
    %c0_i32_0 = arith.constant 0 : i32
    return %arg0, %c0_i32 : i32, i32
  }
}

</mosaic_0001>

<bundles_post_ra>
// kernel: model_5_forward.1
= control target key start
LH: loop header
LB: loop body
LE: loop exit
PB: predicated region body
PF: predicated region fallthrough
CT: control target
= control target key end

     0   :  { %12 = vsyncpa [#allocation3], 0  ;;  %s4516_s0 = inlined_call_operand.vmem [shape: f32[16,784], index: 0, kind: input, shape index: {}]   ;;  %s4517_s1 = inlined_call_operand.hbm [shape: bf16[784,384], index: 1, kind: input, shape index: {}]   ;;  %s4518_s2 = inlined_call_operand.vmem [shape: f32[1,384], index: 2, kind: input, shape index: {}]   ;;  %s4519_s3 = inlined_call_operand.vmem [shape: bf16[384,640], index: 3, kind: input, shape index: {}]   ;;  %s4520_s4 = inlined_call_operand.vmem [shape: f32[1,640], index: 4, kind: input, shape index: {}]   ;;  %s4521_s5 = inlined_call_operand.hbm [shape: bf16[640,128], index: 5, kind: input, shape index: {}]   ;;  %s4522_s6 = inlined_call_operand.vmem [shape: f32[1,128], index: 6, kind: input, shape index: {}]   ;;  %s4523_s7 = inlined_call_operand.vmem [shape: f32[16,128], index: 7, kind: output, shape index: {}]  }
   0x1   :  { %13 = vsyncpa [#allocation5], 0  ;;  %s3945_s24 = smov [#allocation2]   ;;  %s3897_s28 = scalar_lea.hbm %s4517_s1, 18816 }
   0x2   :  { %s21_s25 = sshll.u32 %s3945_s24, 4  ;;  %p3898_p0 = scmp.ne.s32.totalorder %s4517_s1, %s3897_s28  ;;  %s22_s25 = int_to_ptr.vmem [resolvable:$true] %s21_s25 }
   0x3   :  { %p3901_p1 = scmp.lt.u32.totalorder %s3897_s28, %s4517_s1 }
   0x5   :  { %p3903_p2 = pnand %p3901_p1, %p3898_p0 }
   0x7   :  { %3906 = shalt.err (!%p3903_p2)
}
   0x8   :  { %s3907_s10 = scalar_lea.vmem %s22_s25, 18816  ;;  %p3912_p4 = scmp.lt.s32.totalorder %s22_s25, %s22_s25 }
   0x9   :  { %p3908_p3 = scmp.ne.s32.totalorder %s22_s25, %s3907_s10  ;;  %p3913_p5 = scmp.lt.s32.totalorder %s3907_s10, %s3907_s10 }
   0xb   :  { %p3914_p6 = por %p3913_p5, %p3912_p4 }
   0xd   :  { %p3915_p7 = pnand %p3914_p6, %p3908_p3 }
   0xf   :  { %3918 = shalt.err (!%p3915_p7)
}
  0x10   :  { %s3946_s11 = smov 192   ;;  %s3947_s12 = smov 12  }
  0x11   :  { %27 = dma.hbm_to_vmem [thread:$0]  %s4517_s1, 18816, %s22_s25, [#allocation3], %s3946_s11, %s3946_s11, %s3947_s12  }
  0x12   :  { %s3948_s15 = smov [#allocation4]   ;;  %s3919_s19 = scalar_lea.hbm %s4521_s5, 5120 }
  0x13   :  { %s39_s16 = sshll.u32 %s3948_s15, 4  ;;  %p3920_p8 = scmp.ne.s32.totalorder %s4521_s5, %s3919_s19  ;;  %s40_s16 = int_to_ptr.vmem [resolvable:$true] %s39_s16 }
  0x14   :  { %p3923_p9 = scmp.lt.u32.totalorder %s3919_s19, %s4521_s5 }
  0x16   :  { %p3925_p10 = pnand %p3923_p9, %p3920_p8 }
  0x18   :  { %3928 = shalt.err (!%p3925_p10)
}
  0x19   :  { %s3929_s24 = scalar_lea.vmem %s40_s16, 5120  ;;  %p3934_p12 = scmp.lt.s32.totalorder %s40_s16, %s40_s16 }
  0x1a   :  { %p3930_p11 = scmp.ne.s32.totalorder %s40_s16, %s3929_s24  ;;  %p3935_p13 = scmp.lt.s32.totalorder %s3929_s24, %s3929_s24 }
  0x1c   :  { %p3936_p0 = por %p3935_p13, %p3934_p12 }
  0x1e   :  { %p3937_p1 = pnand %p3936_p0, %p3930_p11 }
  0x20   :  { %3940 = shalt.err (!%p3937_p1)
}
  0x21   :  { %s3949_s1 = smov 64   ;;  %s3950_s25 = smov 4  }
  0x22   :  { %45 = dma.hbm_to_vmem [thread:$0]  %s4521_s5, 5120, %s40_s16, [#allocation5], %s3949_s1, %s3949_s1, %s3950_s25  }
  0x23   :  { %3941 = dma.done.wait [#allocation3], 18816  }
  0x24   :  { %3942 = vsyncadd [#allocation3], 4294948480 }
  0x25   :  { %3943 = dma.done.wait [#allocation5], 5120  }
  0x26   :  { %3944 = vsyncadd [#allocation5], 4294962176  ;;  %v3493_v0 = vld [vmem:[#allocation2 + $0x4] ss:$12 sps:$4 sm:$0xff]   ;;  %v3495_v1 = vld [vmem:[#allocation2] ss:$12 sps:$4 sm:$0xff]  }
  0x27   :  { %1077 = vmatprep.subr.bf16.mxu0 %v3493_v0  ;;  %v3496_v2 = vld [vmem:[#allocation2 + $0x1c] ss:$12 sps:$4 sm:$0xff]   ;;  %v3498_v3 = vld [vmem:[#allocation2 + $0x18] ss:$12 sps:$4 sm:$0xff]   ;;  %v3499_v4 = vld [vmem:[#allocation2 + $0x34] ss:$12 sps:$4 sm:$0xff]  }
  0x28   :  { %1078 = vmatpush1.bf16.msra.mxu0 %v3495_v1  ;;  %v3501_v5 = vld [vmem:[#allocation2 + $0x30] ss:$12 sps:$4 sm:$0xff]   ;;  %v3502_v6 = vld [vmem:[#allocation2 + $0x4c] ss:$12 sps:$4 sm:$0xff]   ;;  %v3504_v7 = vld [vmem:[#allocation2 + $0x48] ss:$12 sps:$4 sm:$0xff]  }
  0x29   :  { %1079 = vmatprep.subr.bf16.mxu0 %v3496_v2  ;;  %v3505_v8 = vld [vmem:[#allocation2 + $0x64] ss:$12 sps:$4 sm:$0xff]   ;;  %v3507_v9 = vld [vmem:[#allocation2 + $0x60] ss:$12 sps:$4 sm:$0xff]   ;;  %v3508_v10 = vld [vmem:[#allocation2 + $0x7c] ss:$12 sps:$4 sm:$0xff]  }
  0x2a   :  { %v3510_v11 = vld [vmem:[#allocation2 + $0x78] ss:$12 sps:$4 sm:$0xff]   ;;  %v3511_v12 = vld [vmem:[#allocation2 + $0x94] ss:$12 sps:$4 sm:$0xff]   ;;  %v56_v13 = vld [vmem:[%s4516_s0 + $0x8] sm:$0xff]  ;;  %vm3952_vm0 = vmmov 0  }
  0x2b   :  { %v63_v14 = vld [vmem:[%s4516_s0 + $0x40] sm:$0xff]  ;;  %v3513_v16 = vld [vmem:[#allocation2 + $0x90] ss:$12 sps:$4 sm:$0xff]   ;;  %v3514_v17 = vld [vmem:[#allocation2 + $0xac] ss:$12 sps:$4 sm:$0xff]   ;;  %vm1073_vm1 = vcmask 130048  }
  0x2c   :  { %1080 = vmatpush1.bf16.msra.mxu0 %v3498_v3  ;;  %v70_v15 = vpack.c.bf16 %v63_v14, %v56_v13  ;;  %v3516_v18 = vld [vmem:[#allocation2 + $0xa8] ss:$12 sps:$4 sm:$0xff]   ;;  %v3517_v21 = vld [vmem:[#allocation2 + $0xc4] ss:$12 sps:$4 sm:$0xff]   ;;  %v3552_v22 = vld [vmem:[#allocation2 + $0xe0] ss:$12 sps:$4 sm:$0xff]  }
  0x2d   :  { %1081 = vmatprep.subr.bf16.mxu0 %v3499_v4  ;;  %v3547_v19 = vld [vmem:[#allocation2 + $0xc8] ss:$12 sps:$4 sm:$0xff]   ;;  %v3553_v23 = vld [vmem:[#allocation2 + $0x20] ss:$12 sps:$4 sm:$0xff]   ;;  %v3557_v26 = vld [vmem:[#allocation2 + $0xf8] ss:$12 sps:$4 sm:$0xff]  }
  0x2e   :  { %1109 = vmatprep.mubr.bf16.mxu0 %v70_v15  ;;  %1281 = vmatprep.mubr.bf16.mxu1 %v70_v15  ;;  %v3548_v20 = vld [vmem:[#allocation2 + $0x8] ss:$12 sps:$4 sm:$0xff]   ;;  %v3519_v24 = vld [vmem:[#allocation2 + $0xc0] ss:$12 sps:$4 sm:$0xff]   ;;  %v3558_v27 = vld [vmem:[#allocation2 + $0x38] ss:$12 sps:$4 sm:$0xff]  }
  0x2f   :  { %3254 = vmatprep.subr.bf16.mxu1 %v3547_v19  ;;  %v3520_v25 = vld [vmem:[#allocation2 + $0xdc] ss:$12 sps:$4 sm:$0xff]   ;;  %v3522_v28 = vld [vmem:[#allocation2 + $0xd8] ss:$12 sps:$4 sm:$0xff]   ;;  %v3523_v29 = vld [vmem:[#allocation2 + $0xf4] ss:$12 sps:$4 sm:$0xff]  }
  0x30   :  { %1082 = vmatpush1.bf16.msra.mxu0 %v3501_v5  ;;  %3255 = vmatpush3.bf16.msra.mxu1 %v3548_v20  ;;  %v3562_v30 = vld [vmem:[#allocation2 + $0x110] ss:$12 sps:$4 sm:$0xff]   ;;  %v3567_v33 = vld [vmem:[#allocation2 + $0x128] ss:$12 sps:$4 sm:$0xff]   ;;  %v3526_v34 = vld [vmem:[#allocation2 + $0x10c] ss:$12 sps:$4 sm:$0xff]  }
  0x31   :  { %1083 = vmatprep.subr.bf16.mxu0 %v3502_v6  ;;  %3256 = vmatprep.subr.bf16.mxu1 %v3552_v22  ;;  %v3563_v31 = vld [vmem:[#allocation2 + $0x50] ss:$12 sps:$4 sm:$0xff]   ;;  %v3568_v35 = vld [vmem:[#allocation2 + $0x68] ss:$12 sps:$4 sm:$0xff]   ;;  %v3572_v36 = vld [vmem:[#allocation2 + $0x140] ss:$12 sps:$4 sm:$0xff]  }
  0x32   :  { %v3525_v32 = vld [vmem:[#allocation2 + $0xf0] ss:$12 sps:$4 sm:$0xff]   ;;  %v3528_v37 = vld [vmem:[#allocation2 + $0x108] ss:$12 sps:$4 sm:$0xff]   ;;  %v3573_v39 = vld [vmem:[#allocation2 + $0x80] ss:$12 sps:$4 sm:$0xff]  }
  0x33   :  { %v3529_v38 = vld [vmem:[#allocation2 + $0x124] ss:$12 sps:$4 sm:$0xff]   ;;  %v3531_v41 = vld [vmem:[#allocation2 + $0x120] ss:$12 sps:$4 sm:$0xff]   ;;  %v3532_v42 = vld [vmem:[#allocation2 + $0x13c] ss:$12 sps:$4 sm:$0xff]  }
  0x34   :  { %1084 = vmatpush1.bf16.msra.mxu0 %v3504_v7  ;;  %3257 = vmatpush3.bf16.msra.mxu1 %v3553_v23  ;;  %v3577_v40 = vld [vmem:[#allocation2 + $0x158] ss:$12 sps:$4 sm:$0xff]   ;;  %v3582_v44 = vld [vmem:[#allocation2 + $0x170] ss:$12 sps:$4 sm:$0xff]   ;;  %v3535_v46 = vld [vmem:[#allocation2 + $0x154] ss:$12 sps:$4 sm:$0xff]  }
  0x35   :  { %1085 = vmatprep.subr.bf16.mxu0 %v3505_v8  ;;  %3258 = vmatprep.subr.bf16.mxu1 %v3557_v26  ;;  %v3578_v43 = vld [vmem:[#allocation2 + $0x98] ss:$12 sps:$4 sm:$0xff]   ;;  %v3537_v47 = vld [vmem:[#allocation2 + $0x150] ss:$12 sps:$4 sm:$0xff]   ;;  %v3587_v50 = vld [vmem:[#allocation2 + $0x248] ss:$12 sps:$4 sm:$0xff]  }
  0x36   :  { %v3534_v45 = vld [vmem:[#allocation2 + $0x138] ss:$12 sps:$4 sm:$0xff]   ;;  %v3583_v49 = vld [vmem:[#allocation2 + $0xb0] ss:$12 sps:$4 sm:$0xff]   ;;  %v3588_v53 = vld [vmem:[#allocation2 + $0x188] ss:$12 sps:$4 sm:$0xff]  }
  0x37   :  { %v55_v48 = vld [vmem:[%s4516_s0] sm:$0xff]  ;;  %v62_v51 = vld [vmem:[%s4516_s0 + $0x38] sm:$0xff]  ;;  %v3540_v56 = vld [vmem:[#allocation2 + $0x168] ss:$12 sps:$4 sm:$0xff]  }
  0x38   :  { %1086 = vmatpush1.bf16.msra.mxu0 %v3507_v9  ;;  %3259 = vmatpush3.bf16.msra.mxu1 %v3558_v27  ;;  %v3538_v52 = vld [vmem:[#allocation2 + $0x16c] ss:$12 sps:$4 sm:$0xff]   ;;  %v69_v54 = vpack.c.bf16 %v62_v51, %v55_v48  ;;  %v3543_v57 = vld [vmem:[#allocation2 + $0x184] ss:$12 sps:$4 sm:$0xff]   ;;  %v3546_v61 = vld [vmem:[#allocation2 + $0x19c] ss:$12 sps:$4 sm:$0xff]  }
  0x39   :  { %1087 = vmatprep.subr.bf16.mxu0 %v3508_v10  ;;  %3260 = vmatprep.subr.bf16.mxu1 %v3562_v30  ;;  %v3592_v55 = vld [vmem:[#allocation2 + $0x260] ss:$12 sps:$4 sm:$0xff]   ;;  %v3597_v59 = vld [vmem:[#allocation2 + $0x278] ss:$12 sps:$4 sm:$0xff]   ;;  %v3602_v63 = vld [vmem:[#allocation2 + $0x290] ss:$12 sps:$4 sm:$0xff]  }
  0x3a   :  { %v3593_v58 = vld [vmem:[#allocation2 + $0x1a0] ss:$12 sps:$4 sm:$0xff]   ;;  %v3598_v62 = vld [vmem:[#allocation2 + $0x1b8] ss:$12 sps:$4 sm:$0xff]   ;;  %v3603_v2 = vld [vmem:[#allocation2 + $0x1d0] ss:$12 sps:$4 sm:$0xff]  }
  0x3b   :  { %v3541_v60 = vld [vmem:[#allocation2 + $0x180] ss:$12 sps:$4 sm:$0xff]   ;;  %v3544_v0 = vld [vmem:[#allocation2 + $0x198] ss:$12 sps:$4 sm:$0xff]   ;;  %v3607_v3 = vld [vmem:[#allocation2 + $0x2a8] ss:$12 sps:$4 sm:$0xff]  }
  0x3c   :  { %1088 = vmatpush1.bf16.msra.mxu0 %v3510_v11  ;;  %3261 = vmatpush3.bf16.msra.mxu1 %v3563_v31  ;;  %v3551_v1 = vld [vmem:[#allocation2 + $0x1b4] ss:$12 sps:$4 sm:$0xff]   ;;  %v3549_v4 = vld [vmem:[#allocation2 + $0x1b0] ss:$12 sps:$4 sm:$0xff]   ;;  %v3556_v5 = vld [vmem:[#allocation2 + $0x1cc] ss:$12 sps:$4 sm:$0xff]  }
  0x3d   :  { %1089 = vmatprep.subr.bf16.mxu0 %v3511_v12  ;;  %3262 = vmatprep.subr.bf16.mxu1 %v3567_v33  ;;  %v3608_v6 = vld [vmem:[#allocation2 + $0x1e8] ss:$12 sps:$4 sm:$0xff]   ;;  %v3612_v7 = vld [vmem:[#allocation2 + $0x2c0] ss:$12 sps:$4 sm:$0xff]   ;;  %v58_v8 = vld [vmem:[%s4516_s0 + $0x18] sm:$0xff] }
  0x3e   :  { %v65_v9 = vld [vmem:[%s4516_s0 + $0x50] sm:$0xff]  ;;  %v3613_v13 = vld [vmem:[#allocation2 + $0x200] ss:$12 sps:$4 sm:$0xff]   ;;  %v3617_v14 = vld [vmem:[#allocation2 + $0x2d8] ss:$12 sps:$4 sm:$0xff]  }
  0x3f   :  { %v3554_v10 = vld [vmem:[#allocation2 + $0x1c8] ss:$12 sps:$4 sm:$0xff]   ;;  %v72_v11 = vpack.c.bf16 %v65_v9, %v58_v8  ;;  %v3561_v12 = vld [vmem:[#allocation2 + $0x1e4] ss:$12 sps:$4 sm:$0xff]   ;;  %v3559_v15 = vld [vmem:[#allocation2 + $0x1e0] ss:$12 sps:$4 sm:$0xff]  }
  0x40   :  { %1090 = vmatpush1.bf16.msra.mxu0 %v3513_v16  ;;  %3263 = vmatpush3.bf16.msra.mxu1 %v3568_v35  ;;  %v3566_v16 = vld [vmem:[#allocation2 + $0x1fc] ss:$12 sps:$4 sm:$0xff]   ;;  %v3564_v19 = vld [vmem:[#allocation2 + $0x1f8] ss:$12 sps:$4 sm:$0xff]   ;;  %v3571_v20 = vld [vmem:[#allocation2 + $0x214] ss:$12 sps:$4 sm:$0xff]  }
  0x41   :  { %1091 = vmatprep.subr.bf16.mxu0 %v3514_v17  ;;  %3264 = vmatprep.subr.bf16.mxu1 %v3572_v36  ;;  %v3618_v17 = vld [vmem:[#allocation2 + $0x218] ss:$12 sps:$4 sm:$0xff]   ;;  %v3623_v22 = vld [vmem:[#allocation2 + $0x230] ss:$12 sps:$4 sm:$0xff]   ;;  %v3628_v27 = vld [vmem:[#allocation2 + $0x308] ss:$12 sps:$4 sm:$0xff]  }
  0x42   :  { %v57_v23 = vld [vmem:[%s4516_s0 + $0x10] sm:$0xff]  ;;  %v3576_v26 = vld [vmem:[#allocation2 + $0x22c] ss:$12 sps:$4 sm:$0xff]   ;;  %v3586_v35 = vld [vmem:[#allocation2 + $0x25c] ss:$12 sps:$4 sm:$0xff]  }
  0x43   :  { %v3574_v30 = vld [vmem:[#allocation2 + $0x228] ss:$12 sps:$4 sm:$0xff]   ;;  %v3581_v31 = vld [vmem:[#allocation2 + $0x244] ss:$12 sps:$4 sm:$0xff]   ;;  %v3653_v51 = vld [vmem:[#allocation2 + $0x380] ss:$12 sps:$4 sm:$0xff]  }
  0x44   :  { %1092 = vmatpush1.bf16.msra.mxu0 %v3516_v18  ;;  %3265 = vmatpush3.bf16.msra.mxu1 %v3573_v39  ;;  %v3622_v18 = vld [vmem:[#allocation2 + $0x2f0] ss:$12 sps:$4 sm:$0xff]   ;;  %v3637_v33 = vld [vmem:[#allocation2 + $0x3f8] ss:$12 sps:$4 sm:$0xff]   ;;  %v3591_v39 = vld [vmem:[#allocation2 + $0x274] ss:$12 sps:$4 sm:$0xff]  }
  0x45   :  { %1093 = vmatprep.subr.bf16.mxu0 %v3517_v21  ;;  %3266 = vmatprep.subr.bf16.mxu1 %v3577_v40  ;;  %v3569_v21 = vld [vmem:[#allocation2 + $0x210] ss:$12 sps:$4 sm:$0xff]   ;;  %v3638_v36 = vld [vmem:[#allocation2 + $0x338] ss:$12 sps:$4 sm:$0xff]   ;;  %v3619_v8 = vld [vmem:[#allocation2 + $0x300] ss:$12 sps:$4 sm:$0xff]  }
  0x46   :  { %v3643_v40 = vld [vmem:[#allocation2 + $0x350] ss:$12 sps:$4 sm:$0xff]   ;;  %v67_v48 = vld [vmem:[%s4516_s0 + $0x60] sm:$0xff] }
  0x47   :  { %v3626_v9 = vld [vmem:[#allocation2 + $0x31c] ss:$12 sps:$4 sm:$0xff]  }
  0x48   :  { %1094 = vmatpush1.bf16.msra.mxu0 %v3519_v24  ;;  %3267 = vmatpush3.bf16.msra.mxu1 %v3578_v43  ;;  %v3627_v24 = vld [vmem:[#allocation2 + $0x3c8] ss:$12 sps:$4 sm:$0xff]   ;;  %v3596_v43 = vld [vmem:[#allocation2 + $0x28c] ss:$12 sps:$4 sm:$0xff]  }
  0x49   :  { %1095 = vmatprep.subr.bf16.mxu0 %v3520_v25  ;;  %3268 = vmatprep.subr.bf16.mxu1 %v3582_v44  ;;  %v64_v25 = vld [vmem:[%s4516_s0 + $0x48] sm:$0xff] }
  0x4a   :  { %v3648_v44 = vld [vmem:[#allocation2 + $0x368] ss:$12 sps:$4 sm:$0xff]  }
  0x4c   :  { %1096 = vmatpush1.bf16.msra.mxu0 %v3522_v28  ;;  %3269 = vmatpush3.bf16.msra.mxu1 %v3583_v49  ;;  %v4042_v28 = vpack.c.bf16 %v64_v25, %v57_v23  ;;  %v3601_v49 = vld [vmem:[#allocation2 + $0x2a4] ss:$12 sps:$4 sm:$0xff]   ;;  %v3646_v23 = vld [vmem:[#allocation2 + $0x37c] ss:$12 sps:$4 sm:$0xff]   ;;  %v3707_v25 = vld [vmem:[%s4519_s3 + $0x78] ss:$20 sps:$4 sm:$0xff]  }
  0x4d   :  { %1097 = vmatprep.subr.bf16.mxu0 %v3523_v29  ;;  %3276 = vmatprep.subr.bf16.mxu1 %v3587_v50  ;;  %v3632_v29 = vld [vmem:[#allocation2 + $0x3e0] ss:$12 sps:$4 sm:$0xff]  }
  0x4f   :  { %1282 = vmatmul.mubr.bf16.vlgmr.msra.gmra.mrb[0].mxu1 %v69_v54 }
  0x50   :  { %1098 = vmatpush1.bf16.msra.mxu0 %v3525_v32  ;;  %3277 = vmatpush3.bf16.msra.mxu1 %v3588_v53  ;;  %v3633_v32 = vld [vmem:[#allocation2 + $0x320] ss:$12 sps:$4 sm:$0xff]  }
  0x51   :  { %1099 = vmatprep.subr.bf16.mxu0 %v3526_v34  ;;  %3278 = vmatprep.subr.bf16.mxu1 %v3592_v55  ;;  %v3579_v34 = vld [vmem:[#allocation2 + $0x240] ss:$12 sps:$4 sm:$0xff]   ;;  %v3658_v55 = vld [vmem:[#allocation2 + $0x398] ss:$12 sps:$4 sm:$0xff]  }
  0x52   :  { %1322 = vmatprep.mubr.bf16.mxu1 %v72_v11  ;;  %v3599_v53 = vld [vmem:[#allocation2 + $0x2a0] ss:$12 sps:$4 sm:$0xff]  }
  0x54   :  { %1100 = vmatpush1.bf16.msra.mxu0 %v3528_v37  ;;  %3279 = vmatpush3.bf16.msra.mxu1 %v3593_v58  ;;  %v3642_v37 = vld [vmem:[#allocation2 + $0x410] ss:$12 sps:$4 sm:$0xff]   ;;  %v3611_v58 = vld [vmem:[#allocation2 + $0x2d4] ss:$12 sps:$4 sm:$0xff]  }
  0x55   :  { %1101 = vmatprep.subr.bf16.mxu0 %v3529_v38  ;;  %3280 = vmatprep.subr.bf16.mxu1 %v3597_v59  ;;  %v3584_v38 = vld [vmem:[#allocation2 + $0x258] ss:$12 sps:$4 sm:$0xff]   ;;  %v3663_v59 = vld [vmem:[#allocation2 + $0x3b0] ss:$12 sps:$4 sm:$0xff]  }
  0x58   :  { %1102 = vmatpush1.bf16.msra.mxu0 %v3531_v41  ;;  %3281 = vmatpush3.bf16.msra.mxu1 %v3598_v62  ;;  %v3647_v41 = vld [vmem:[#allocation2 + $0x428] ss:$12 sps:$4 sm:$0xff]   ;;  %v3609_v62 = vld [vmem:[#allocation2 + $0x2d0] ss:$12 sps:$4 sm:$0xff]  }
  0x59   :  { %1103 = vmatprep.subr.bf16.mxu0 %v3532_v42  ;;  %3282 = vmatprep.subr.bf16.mxu1 %v3602_v63  ;;  %v3589_v42 = vld [vmem:[#allocation2 + $0x270] ss:$12 sps:$4 sm:$0xff]   ;;  %v3616_v63 = vld [vmem:[#allocation2 + $0x2ec] ss:$12 sps:$4 sm:$0xff]  }
  0x5c   :  { %1104 = vmatpush1.bf16.msra.mxu0 %v3534_v45  ;;  %3283 = vmatpush3.bf16.msra.mxu1 %v3603_v2  ;;  %v3652_v45 = vld [vmem:[#allocation2 + $0x440] ss:$12 sps:$4 sm:$0xff]   ;;  %v3951_v2 = vmov 0.0  }
  0x5d   :  { %1105 = vmatprep.subr.bf16.mxu0 %v3535_v46  ;;  %3284 = vmatprep.subr.bf16.mxu1 %v3607_v3  ;;  %v60_v46 = vld [vmem:[%s4516_s0 + $0x28] sm:$0xff]  ;;  %v3691_v3 = vld [vmem:[%s4519_s3 + $0x4] ss:$20 sps:$4 sm:$0xff]  }
  0x5e   :  { %v74_v50 = vpack.c.bf16 %v67_v48, %v60_v46  ;;  %v3680_v46 = vld [vmem:[#allocation2 + $0x450] ss:$12 sps:$4 sm:$0xff]   ;;  %v3683_v48 = vld [vmem:[#allocation2 + $0x468] ss:$12 sps:$4 sm:$0xff]  }
  0x60   :  { %1106 = vmatpush1.bf16.msra.mxu0 %v3537_v47  ;;  %3285 = vmatpush3.bf16.msra.mxu1 %v3608_v6  ;;  %v3594_v47 = vld [vmem:[#allocation2 + $0x288] ss:$12 sps:$4 sm:$0xff]  }
  0x61   :  { %1107 = vmatprep.subr.bf16.mxu0 %v3538_v52  ;;  %3286 = vmatprep.subr.bf16.mxu1 %v3612_v7  ;;  %v3657_v52 = vld [vmem:[#allocation2 + $0x458] ss:$12 sps:$4 sm:$0xff]   ;;  %v61_v6 = vld [vmem:[%s4516_s0 + $0x30] sm:$0xff]  ;;  %v68_v7 = vld [vmem:[%s4516_s0 + $0x68] sm:$0xff] }
  0x64   :  { %1108 = vmatpush1.bf16.msra.mxu0 %v3540_v56  ;;  %3287 = vmatpush3.bf16.msra.mxu1 %v3613_v13  ;;  %v3604_v56 = vld [vmem:[#allocation2 + $0x2b8] ss:$12 sps:$4 sm:$0xff]  }
  0x65   :  { %1120 = vmatprep.subr.bf16.mxu0 %v3543_v57  ;;  %3288 = vmatprep.subr.bf16.mxu1 %v3617_v14  ;;  %v3662_v57 = vld [vmem:[#allocation2 + $0x470] ss:$12 sps:$4 sm:$0xff]   ;;  %v3624_v13 = vld [vmem:[#allocation2 + $0x318] ss:$12 sps:$4 sm:$0xff]   ;;  %v3631_v14 = vld [vmem:[#allocation2 + $0x334] ss:$12 sps:$4 sm:$0xff]  }
  0x67   :  { %1110 = vmatmul.mubr.bf16.vlgmr.msra.gmra.mrb[0].mxu0 %v69_v54  ;;  %v3606_v54 = vld [vmem:[#allocation2 + $0x2bc] ss:$12 sps:$4 sm:$0xff]  }
  0x68   :  { %1121 = vmatpush1.bf16.msra.mxu0 %v3541_v60  ;;  %1152 = vmatprep.mubr.bf16.mxu0 %v72_v11  ;;  %v59_v60 = vld [vmem:[%s4516_s0 + $0x20] sm:$0xff]  ;;  %v4075_v11 = vpack.c.bf16 %v68_v7, %v61_v6 }
  0x69   :  { %1122 = vmatprep.subr.bf16.mxu0 %v3546_v61  ;;  %3289 = vmatpush3.bf16.msra.mxu1 %v3618_v17  ;;  %v66_v61 = vld [vmem:[%s4516_s0 + $0x58] sm:$0xff]  ;;  %v3722_v6 = vld [vmem:[%s4519_s3 + $0xd0] ss:$20 sps:$4 sm:$0xff]  }
  0x6a   :  { %3290 = vmatprep.subr.bf16.mxu1 %v3622_v18  ;;  %v3629_v17 = vld [vmem:[#allocation2 + $0x330] ss:$12 sps:$4 sm:$0xff]   ;;  %v3636_v18 = vld [vmem:[#allocation2 + $0x34c] ss:$12 sps:$4 sm:$0xff]  }
  0x6b   :  { %v3739_v7 = vld [vmem:[%s4519_s3 + $0x144] ss:$20 sps:$4 sm:$0xff]  }
  0x6c   :  { %1123 = vmatpush1.bf16.msra.mxu0 %v3544_v0  ;;  %v4057_v0 = vpack.c.bf16 %v66_v61, %v59_v60  ;;  %v3712_v60 = vld [vmem:[%s4519_s3 + $0x84] ss:$20 sps:$4 sm:$0xff]   ;;  %v3710_v61 = vld [vmem:[%s4519_s3 + $0x80] ss:$20 sps:$4 sm:$0xff]  }
  0x6d   :  { %1124 = vmatprep.subr.bf16.mxu0 %v3551_v1  ;;  %3291 = vmatpush3.bf16.msra.mxu1 %v3623_v22  ;;  %v3670_v1 = vld [vmem:[#allocation2 + $0x488] ss:$12 sps:$4 sm:$0xff]   ;;  %v3639_v22 = vld [vmem:[#allocation2 + $0x360] ss:$12 sps:$4 sm:$0xff]  }
  0x6e   :  { %3298 = vmatprep.subr.bf16.mxu1 %v3627_v24  ;;  %v3644_v24 = vld [vmem:[#allocation2 + $0x378] ss:$12 sps:$4 sm:$0xff]  }
  0x70   :  { %1125 = vmatpush1.bf16.msra.mxu0 %v3549_v4  ;;  %1323 = vmatmul.mubr.bf16.vlgmr.msra.gmra.mrb[4].mxu1 %v4042_v28  ;;  %v3614_v4 = vld [vmem:[#allocation2 + $0x2e8] ss:$12 sps:$4 sm:$0xff]  }
  0x71   :  { %1126 = vmatprep.subr.bf16.mxu0 %v3556_v5  ;;  %3299 = vmatpush3.bf16.msra.mxu1 %v3628_v27  ;;  %v3621_v5 = vld [vmem:[#allocation2 + $0x304] ss:$12 sps:$4 sm:$0xff]   ;;  %v3651_v27 = vld [vmem:[#allocation2 + $0x394] ss:$12 sps:$4 sm:$0xff]  }
  0x72   :  { %3300 = vmatprep.subr.bf16.mxu1 %v3632_v29  ;;  %1363 = vmatprep.mubr.bf16.mxu1 %v74_v50  ;;  %v3656_v29 = vld [vmem:[#allocation2 + $0x3ac] ss:$12 sps:$4 sm:$0xff]  }
  0x74   :  { %1127 = vmatpush1.bf16.msra.mxu0 %v3554_v10  ;;  %v3689_v10 = vld [vmem:[%s4519_s3] ss:$20 sps:$4 sm:$0xff]  }
  0x75   :  { %1128 = vmatprep.subr.bf16.mxu0 %v3561_v12  ;;  %3301 = vmatpush3.bf16.msra.mxu1 %v3633_v32  ;;  %v3697_v12 = vld [vmem:[%s4519_s3 + $0x2c] ss:$20 sps:$4 sm:$0xff]  }
  0x76   :  { %3302 = vmatprep.subr.bf16.mxu1 %v3637_v33  ;;  %v3659_v32 = vld [vmem:[#allocation2 + $0x3c0] ss:$12 sps:$4 sm:$0xff]   ;;  %v3666_v33 = vld [vmem:[#allocation2 + $0x3dc] ss:$12 sps:$4 sm:$0xff]  }
  0x78   :  { %1129 = vmatpush1.bf16.msra.mxu0 %v3559_v15  ;;  %v3695_v15 = vld [vmem:[%s4519_s3 + $0x28] ss:$20 sps:$4 sm:$0xff]  }
  0x79   :  { %1130 = vmatprep.subr.bf16.mxu0 %v3566_v16  ;;  %3303 = vmatpush3.bf16.msra.mxu1 %v3638_v36  ;;  %v3703_v16 = vld [vmem:[%s4519_s3 + $0x54] ss:$20 sps:$4 sm:$0xff]   ;;  %v3667_v36 = vld [vmem:[#allocation2 + $0x3f0] ss:$12 sps:$4 sm:$0xff]  }
  0x7a   :  { %3304 = vmatprep.subr.bf16.mxu1 %v3642_v37  ;;  %v3673_v37 = vld [vmem:[#allocation2 + $0x40c] ss:$12 sps:$4 sm:$0xff]  }
  0x7c   :  { %1131 = vmatpush1.bf16.msra.mxu0 %v3564_v19  ;;  %v3701_v19 = vld [vmem:[%s4519_s3 + $0x50] ss:$20 sps:$4 sm:$0xff]  }
  0x7d   :  { %1132 = vmatprep.subr.bf16.mxu0 %v3571_v20  ;;  %3305 = vmatpush3.bf16.msra.mxu1 %v3643_v40  ;;  %v3634_v20 = vld [vmem:[#allocation2 + $0x348] ss:$12 sps:$4 sm:$0xff]   ;;  %v3674_v40 = vld [vmem:[#allocation2 + $0x420] ss:$12 sps:$4 sm:$0xff]  }
  0x7e   :  { %3306 = vmatprep.subr.bf16.mxu1 %v3647_v41  ;;  %v3679_v41 = vld [vmem:[#allocation2 + $0x43c] ss:$12 sps:$4 sm:$0xff]  }
  0x80   :  { %1133 = vmatpush1.bf16.msra.mxu0 %v3569_v21  ;;  %v3641_v21 = vld [vmem:[#allocation2 + $0x364] ss:$12 sps:$4 sm:$0xff]  }
  0x81   :  { %1134 = vmatprep.subr.bf16.mxu0 %v3576_v26  ;;  %3307 = vmatpush3.bf16.msra.mxu1 %v3648_v44  ;;  %v3709_v26 = vld [vmem:[%s4519_s3 + $0x7c] ss:$20 sps:$4 sm:$0xff]   ;;  %v3715_v44 = vld [vmem:[%s4519_s3 + $0xa4] ss:$20 sps:$4 sm:$0xff]  }
  0x82   :  { %3308 = vmatprep.subr.bf16.mxu1 %v3652_v45  ;;  %v3682_v45 = vld [vmem:[#allocation2 + $0x454] ss:$12 sps:$4 sm:$0xff]  }
  0x84   :  { %1135 = vmatpush1.bf16.msra.mxu0 %v3574_v30  ;;  %v3654_v30 = vld [vmem:[#allocation2 + $0x3a8] ss:$12 sps:$4 sm:$0xff]  }
  0x85   :  { %1136 = vmatprep.subr.bf16.mxu0 %v3581_v31  ;;  %3309 = vmatpush3.bf16.msra.mxu1 %v3653_v51  ;;  %v3661_v31 = vld [vmem:[#allocation2 + $0x3c4] ss:$12 sps:$4 sm:$0xff]   ;;  %v3694_v51 = vld [vmem:[%s4519_s3 + $0xc] ss:$20 sps:$4 sm:$0xff]  }
  0x86   :  { %3310 = vmatprep.subr.bf16.mxu1 %v3657_v52  ;;  %v3953_v52 = vmov 0  }
  0x88   :  { %1137 = vmatpush1.bf16.msra.mxu0 %v3579_v34  ;;  %v3664_v34 = vld [vmem:[#allocation2 + $0x3d8] ss:$12 sps:$4 sm:$0xff]  }
  0x89   :  { %1138 = vmatprep.subr.bf16.mxu0 %v3586_v35  ;;  %3311 = vmatpush3.bf16.msra.mxu1 %v3658_v55  ;;  %v3669_v35 = vld [vmem:[#allocation2 + $0x3f4] ss:$12 sps:$4 sm:$0xff]   ;;  %v3698_v55 = vld [vmem:[%s4519_s3 + $0x30] ss:$20 sps:$4 sm:$0xff]  }
  0x8a   :  { %3312 = vmatprep.subr.bf16.mxu1 %v3662_v57  ;;  %v3719_v57 = vld [vmem:[%s4519_s3 + $0xc8] ss:$20 sps:$4 sm:$0xff]  }
  0x8c   :  { %1139 = vmatpush1.bf16.msra.mxu0 %v3584_v38  ;;  %v3671_v38 = vld [vmem:[#allocation2 + $0x408] ss:$12 sps:$4 sm:$0xff]  }
  0x8d   :  { %1140 = vmatprep.subr.bf16.mxu0 %v3591_v39  ;;  %3313 = vmatpush3.bf16.msra.mxu1 %v3663_v59  ;;  %v3676_v39 = vld [vmem:[#allocation2 + $0x424] ss:$12 sps:$4 sm:$0xff]   ;;  %v3704_v59 = vld [vmem:[%s4519_s3 + $0x58] ss:$20 sps:$4 sm:$0xff]  }
  0x8e   :  { %3406 = vmatprep.subr.bf16.mxu1 %v3951_v2 }
  0x90   :  { %1141 = vmatpush1.bf16.msra.mxu0 %v3589_v42  ;;  %1364 = vmatmul.mubr.bf16.vlgmr.msra.gmra.mrb[8].mxu1 %v4057_v0  ;;  %v3677_v42 = vld [vmem:[#allocation2 + $0x438] ss:$12 sps:$4 sm:$0xff]  }
  0x91   :  { %1142 = vmatprep.subr.bf16.mxu0 %v3596_v43  ;;  %3407 = vmatpush3.bf16.msra.mxu1 %v3670_v1  ;;  %v3713_v43 = vld [vmem:[%s4519_s3 + $0xa0] ss:$20 sps:$4 sm:$0xff]   ;;  %v3716_v1 = vld [vmem:[%s4519_s3 + $0xa8] ss:$20 sps:$4 sm:$0xff]  }
  0x92   :  { %3408 = vmatprep.mubr.msk.bf16.mxu1 %vm3952_vm0, %v3951_v2  ;;  %2217 = vmatprep.subr.bf16.mxu1 %v3691_v3  ;;  %v3724_v3 = vld [vmem:[%s4519_s3 + $0xd4] ss:$20 sps:$4 sm:$0xff]  }
  0x94   :  { %1143 = vmatpush1.bf16.msra.mxu0 %v3594_v47  ;;  %v3685_v47 = vld [vmem:[#allocation2 + $0x46c] ss:$12 sps:$4 sm:$0xff]  }
  0x95   :  { %1144 = vmatprep.subr.bf16.mxu0 %v3601_v49  ;;  %v3688_v49 = vld [vmem:[#allocation2 + $0x484] ss:$12 sps:$4 sm:$0xff]  }
  0x98   :  { %1145 = vmatpush1.bf16.msra.mxu0 %v3599_v53  ;;  %3409 = vmatmul.mubr.msk.bf16.vlgmr.msra.gmra.mrb[12].mxu1 %vm1073_vm1, %v4075_v11  ;;  %v3692_v53 = vld [vmem:[%s4519_s3 + $0x8] ss:$20 sps:$4 sm:$0xff]  }
  0x99   :  { %1146 = vmatprep.subr.bf16.mxu0 %v3606_v54  ;;  %2218 = vmatpush1.bf16.msra.mxu1 %v3689_v10  ;;  %v3700_v54 = vld [vmem:[%s4519_s3 + $0x34] ss:$20 sps:$4 sm:$0xff]   ;;  %v3745_v10 = vld [vmem:[%s4519_s3 + $0x16c] ss:$20 sps:$4 sm:$0xff]  }
  0x9a   :  { %2219 = vmatprep.subr.bf16.mxu1 %v3697_v12  ;;  %v3736_v12 = vld [vmem:[%s4519_s3 + $0x124] ss:$20 sps:$4 sm:$0xff]  }
  0x9c   :  { %1147 = vmatpush1.bf16.msra.mxu0 %v3604_v56  ;;  %v3706_v56 = vld [vmem:[%s4519_s3 + $0x5c] ss:$20 sps:$4 sm:$0xff]  }
  0x9d   :  { %1148 = vmatprep.subr.bf16.mxu0 %v3611_v58  ;;  %2220 = vmatpush1.bf16.msra.mxu1 %v3695_v15  ;;  %v3721_v58 = vld [vmem:[%s4519_s3 + $0xcc] ss:$20 sps:$4 sm:$0xff]  }
  0x9e   :  { %2221 = vmatprep.subr.bf16.mxu1 %v3703_v16  ;;  %v3734_v15 = vld [vmem:[%s4519_s3 + $0x120] ss:$20 sps:$4 sm:$0xff]  }
  0x9f   :  { %v3742_v16 = vld [vmem:[%s4519_s3 + $0x14c] ss:$20 sps:$4 sm:$0xff]  }
  0xa0   :  { %1149 = vmatpush1.bf16.msra.mxu0 %v3609_v62  ;;  %v3718_v62 = vld [vmem:[%s4519_s3 + $0xac] ss:$20 sps:$4 sm:$0xff]  }
  0xa1   :  { %1150 = vmatprep.subr.bf16.mxu0 %v3616_v63  ;;  %2222 = vmatpush1.bf16.msra.mxu1 %v3701_v19  ;;  %v3725_v63 = vld [vmem:[%s4519_s3 + $0xf0] ss:$20 sps:$4 sm:$0xff]   ;;  %v3740_v19 = vld [vmem:[%s4519_s3 + $0x148] ss:$20 sps:$4 sm:$0xff]  }
  0xa2   :  { %2223 = vmatprep.subr.bf16.mxu1 %v3709_v26  ;;  %v3769_v26 = vld [vmem:[%s4519_s3 + $0x20c] ss:$20 sps:$4 sm:$0xff]  }
  0xa4   :  { %1151 = vmatpush1.bf16.msra.mxu0 %v3614_v4  ;;  %v3731_v4 = vld [vmem:[%s4519_s3 + $0x118] ss:$20 sps:$4 sm:$0xff]  }
  0xa5   :  { %1163 = vmatprep.subr.bf16.mxu0 %v3621_v5  ;;  %2224 = vmatpush1.bf16.msra.mxu1 %v3707_v25  ;;  %v3733_v5 = vld [vmem:[%s4519_s3 + $0x11c] ss:$20 sps:$4 sm:$0xff]   ;;  %v3761_v25 = vld [vmem:[%s4519_s3 + $0x1e0] ss:$20 sps:$4 sm:$0xff]  }
  0xa6   :  { %2225 = vmatprep.subr.bf16.mxu1 %v3715_v44  ;;  %v3773_v44 = vld [vmem:[%s4519_s3 + $0x230] ss:$20 sps:$4 sm:$0xff]  }
  0xa7   :  { %1153 = vmatmul.mubr.bf16.vlgmr.msra.gmra.mrb[0].mxu0 %v4042_v28  ;;  %v3649_v28 = vld [vmem:[#allocation2 + $0x390] ss:$12 sps:$4 sm:$0xff]  }
  0xa8   :  { %1164 = vmatpush1.bf16.msra.mxu0 %v3619_v8  ;;  %1195 = vmatprep.mubr.bf16.mxu0 %v74_v50  ;;  %v3686_v50 = vld [vmem:[#allocation2 + $0x480] ss:$12 sps:$4 sm:$0xff]   ;;  %v3730_v8 = vld [vmem:[%s4519_s3 + $0xfc] ss:$20 sps:$4 sm:$0xff]  }
  0xa9   :  { %1165 = vmatprep.subr.bf16.mxu0 %v3626_v9  ;;  %2226 = vmatpush1.bf16.msra.mxu1 %v3713_v43  ;;  %v3737_v9 = vld [vmem:[%s4519_s3 + $0x140] ss:$20 sps:$4 sm:$0xff]   ;;  %v3778_v43 = vld [vmem:[%s4519_s3 + $0x23c] ss:$20 sps:$4 sm:$0xff]  }
  0xaa   :  { %2227 = vmatprep.subr.bf16.mxu1 %v3721_v58 }
  0xac   :  { %1166 = vmatpush1.bf16.msra.mxu0 %v3624_v13  ;;  %v3743_v13 = vld [vmem:[%s4519_s3 + $0x168] ss:$20 sps:$4 sm:$0xff]  }
  0xad   :  { %1167 = vmatprep.subr.bf16.mxu0 %v3631_v14  ;;  %2228 = vmatpush1.bf16.msra.mxu1 %v3719_v57  ;;  %v3751_v14 = vld [vmem:[%s4519_s3 + $0x194] ss:$20 sps:$4 sm:$0xff]  }
  0xb0   :  { %1168 = vmatpush1.bf16.msra.mxu0 %v3629_v17  ;;  %v3749_v17 = vld [vmem:[%s4519_s3 + $0x190] ss:$20 sps:$4 sm:$0xff]  }
  0xb1   :  { %1169 = vmatprep.subr.bf16.mxu0 %v3636_v18  ;;  %v3757_v18 = vld [vmem:[%s4519_s3 + $0x1bc] ss:$20 sps:$4 sm:$0xff]  }
  0xb4   :  { %1170 = vmatpush1.bf16.msra.mxu0 %v3634_v20  ;;  %v3748_v20 = vld [vmem:[%s4519_s3 + $0x174] ss:$20 sps:$4 sm:$0xff]  }
  0xb5   :  { %1171 = vmatprep.subr.bf16.mxu0 %v3641_v21  ;;  %v3755_v21 = vld [vmem:[%s4519_s3 + $0x1b8] ss:$20 sps:$4 sm:$0xff]  }
  0xb8   :  { %1172 = vmatpush1.bf16.msra.mxu0 %v3639_v22  ;;  %v3763_v22 = vld [vmem:[%s4519_s3 + $0x1e4] ss:$20 sps:$4 sm:$0xff]  }
  0xb9   :  { %1173 = vmatprep.subr.bf16.mxu0 %v3646_v23  ;;  %v3746_v23 = vld [vmem:[%s4519_s3 + $0x170] ss:$20 sps:$4 sm:$0xff]  }
  0xbc   :  { %1174 = vmatpush1.bf16.msra.mxu0 %v3644_v24  ;;  %v3754_v24 = vld [vmem:[%s4519_s3 + $0x19c] ss:$20 sps:$4 sm:$0xff]  }
  0xbd   :  { %1175 = vmatprep.subr.bf16.mxu0 %v3651_v27  ;;  %v3752_v27 = vld [vmem:[%s4519_s3 + $0x198] ss:$20 sps:$4 sm:$0xff]  }
  0xc0   :  { %1176 = vmatpush1.bf16.msra.mxu0 %v3649_v28  ;;  %v3760_v28 = vld [vmem:[%s4519_s3 + $0x1c4] ss:$20 sps:$4 sm:$0xff]  }
  0xc1   :  { %1177 = vmatprep.subr.bf16.mxu0 %v3656_v29  ;;  %v3767_v29 = vld [vmem:[%s4519_s3 + $0x208] ss:$20 sps:$4 sm:$0xff]  }
  0xc4   :  { %1178 = vmatpush1.bf16.msra.mxu0 %v3654_v30  ;;  %v3758_v30 = vld [vmem:[%s4519_s3 + $0x1c0] ss:$20 sps:$4 sm:$0xff]  }
  0xc5   :  { %1179 = vmatprep.subr.bf16.mxu0 %v3661_v31  ;;  %v3766_v31 = vld [vmem:[%s4519_s3 + $0x1ec] ss:$20 sps:$4 sm:$0xff]  }
  0xc8   :  { %1180 = vmatpush1.bf16.msra.mxu0 %v3659_v32  ;;  %v3764_v32 = vld [vmem:[%s4519_s3 + $0x1e8] ss:$20 sps:$4 sm:$0xff]  }
  0xc9   :  { %1181 = vmatprep.subr.bf16.mxu0 %v3666_v33  ;;  %v3772_v33 = vld [vmem:[%s4519_s3 + $0x214] ss:$20 sps:$4 sm:$0xff]  }
  0xcc   :  { %1182 = vmatpush1.bf16.msra.mxu0 %v3664_v34  ;;  %v3770_v34 = vld [vmem:[%s4519_s3 + $0x210] ss:$20 sps:$4 sm:$0xff]  }
  0xcd   :  { %1183 = vmatprep.subr.bf16.mxu0 %v3669_v35 }
  0xd0   :  { %1184 = vmatpush1.bf16.msra.mxu0 %v3667_v36 }
  0xd1   :  { %1185 = vmatprep.subr.bf16.mxu0 %v3673_v37 }
  0xd4   :  { %1186 = vmatpush1.bf16.msra.mxu0 %v3671_v38 }
  0xd5   :  { %1187 = vmatprep.subr.bf16.mxu0 %v3676_v39 }
  0xd8   :  { %1188 = vmatpush1.bf16.msra.mxu0 %v3674_v40 }
  0xd9   :  { %1189 = vmatprep.subr.bf16.mxu0 %v3679_v41  ;;  %v274_v41 = vlaneseq }
  0xdc   :  { %1190 = vmatpush1.bf16.msra.mxu0 %v3677_v42  ;;  %v3775_v42 = vld [vmem:[%s4519_s3 + $0x234] ss:$20 sps:$4 sm:$0xff]  }
  0xdd   :  { %1191 = vmatprep.subr.bf16.mxu0 %v3682_v45  ;;  %v3776_v45 = vld [vmem:[%s4519_s3 + $0x238] ss:$20 sps:$4 sm:$0xff]  }
  0xe0   :  { %1192 = vmatpush1.bf16.msra.mxu0 %v3680_v46  ;;  %v4258_v46 = vshrl.u32 %v274_v41, 7  ;;  %v3793_v41 = vld [vmem:[%s4519_s3 + $0x2ac] ss:$20 sps:$4 sm:$0xff]  }
  0xe1   :  { %1193 = vmatprep.subr.bf16.mxu0 %v3685_v47  ;;  %v3781_v47 = vld [vmem:[%s4519_s3 + $0x25c] ss:$20 sps:$4 sm:$0xff]  }
  0xe4   :  { %1194 = vmatpush1.bf16.msra.mxu0 %v3683_v48  ;;  %v3784_v48 = vld [vmem:[%s4519_s3 + $0x264] ss:$20 sps:$4 sm:$0xff]  }
  0xe5   :  { %1206 = vmatprep.subr.bf16.mxu0 %v3688_v49  ;;  %v3779_v49 = vld [vmem:[%s4519_s3 + $0x258] ss:$20 sps:$4 sm:$0xff]  }
  0xe7   :  { %1196 = vmatmul.mubr.bf16.vlgmr.msra.gmra.mrb[0].mxu0 %v4057_v0  ;;  %v3727_v0 = vld [vmem:[%s4519_s3 + $0xf4] ss:$20 sps:$4 sm:$0xff]  }
  0xe8   :  { %1207 = vmatpush1.bf16.msra.mxu0 %v3686_v50  ;;  %1238 = vmatprep.mubr.bf16.mxu0 %v3953_v52  ;;  %v3782_v50 = vld [vmem:[%s4519_s3 + $0x260] ss:$20 sps:$4 sm:$0xff]  }
  0xe9   :  { %2303 = vmatprep.subr.bf16.mxu0 %v3694_v51  ;;  %2229 = vmatprep.subr.bf16.mxu1 %v3727_v0  ;;  %v284_v51 = vsub.s32 2, %v4258_v46 }
  0xea   :  { %2230 = vmatpush1.bf16.msra.mxu1 %v3725_v63 }
  0xeb   :  { %2231 = vmatprep.subr.bf16.mxu1 %v3733_v5 }
  0xee   :  { %2232 = vmatpush1.bf16.msra.mxu1 %v3731_v4 }
  0xef   :  { %2233 = vmatprep.subr.bf16.mxu1 %v3739_v7 }
  0xf2   :  { %2234 = vmatpush1.bf16.msra.mxu1 %v3737_v9 }
  0xf3   :  { %3091 = vmatmul.mubr.msk.bf16.vlgmr.msra.gmra.mrb[0].mxu0 %vm1073_vm1, %v4075_v11  ;;  %v3728_v11 = vld [vmem:[%s4519_s3 + $0xf8] ss:$20 sps:$4 sm:$0xff]   ;;  %2235 = vmatprep.subr.bf16.mxu1 %v3745_v10 }
  0xf4   :  { %2304 = vmatpush1.bf16.msra.mxu0 %v3692_v53  ;;  %v272_v53 = vld [vmem:[%s4518_s2] sm:$0x7] }
  0xf5   :  { %2305 = vmatprep.subr.bf16.mxu0 %v3700_v54  ;;  %v3787_v54 = vld [vmem:[%s4519_s3 + $0x284] ss:$20 sps:$4 sm:$0xff]  }
  0xf6   :  { %2236 = vmatpush1.bf16.msra.mxu1 %v3743_v13 }
  0xf7   :  { %2237 = vmatprep.subr.bf16.mxu1 %v3751_v14 }
  0xf8   :  { %2306 = vmatpush1.bf16.msra.mxu0 %v3698_v55  ;;  %v3790_v55 = vld [vmem:[%s4519_s3 + $0x28c] ss:$20 sps:$4 sm:$0xff]  }
  0xf9   :  { %2307 = vmatprep.subr.bf16.mxu0 %v3706_v56  ;;  %v285_v56 = vrot.slane %v272_v53, %v284_v51 }
  0xfa   :  { %2238 = vmatpush1.bf16.msra.mxu1 %v3749_v17 }
  0xfb   :  { %2239 = vmatprep.subr.bf16.mxu1 %v3757_v18 }
  0xfc   :  { %2308 = vmatpush1.bf16.msra.mxu0 %v3704_v59 }
  0xfd   :  { %2309 = vmatprep.subr.bf16.mxu0 %v3712_v60 }
  0xfe   :  { %2240 = vmatpush1.bf16.msra.mxu1 %v3755_v21  ;;  %v276_v21 = vsub.s32 0, %v4258_v46 }
  0xff   :  { %2241 = vmatprep.subr.bf16.mxu1 %v3763_v22  ;;  %v280_v22 = vsub.s32 1, %v4258_v46 }
 0x100   :  { %2310 = vmatpush1.bf16.msra.mxu0 %v3710_v61 }
 0x101   :  { %2311 = vmatprep.subr.bf16.mxu0 %v3718_v62 }
 0x102   :  { %2242 = vmatpush1.bf16.msra.mxu1 %v3761_v25 }
 0x103   :  { %2243 = vmatprep.subr.bf16.mxu1 %v3769_v26 }
 0x104   :  { %2312 = vmatpush1.bf16.msra.mxu0 %v3716_v1 }
 0x105   :  { %2313 = vmatprep.subr.bf16.mxu0 %v3724_v3 }
 0x106   :  { %2244 = vmatpush1.bf16.msra.mxu1 %v3767_v29 }
 0x107   :  { %2245 = vmatprep.subr.bf16.mxu1 %v3775_v42  ;;  %v3796_v42 = vld [vmem:[%s4519_s3 + $0x2b4] ss:$20 sps:$4 sm:$0xff]  }
 0x108   :  { %2314 = vmatpush1.bf16.msra.mxu0 %v3722_v6 }
 0x109   :  { %2315 = vmatprep.subr.bf16.mxu0 %v3730_v8 }
 0x10a   :  { %2246 = vmatpush1.bf16.msra.mxu1 %v3773_v44  ;;  %v3794_v44 = vld [vmem:[%s4519_s3 + $0x2b0] ss:$20 sps:$4 sm:$0xff]  }
 0x10b   :  { %2247 = vmatprep.subr.bf16.mxu1 %v3781_v47  ;;  %v3802_v47 = vld [vmem:[%s4519_s3 + $0x2dc] ss:$20 sps:$4 sm:$0xff]  }
 0x10c   :  { %2316 = vmatpush1.bf16.msra.mxu0 %v3728_v11 }
 0x10d   :  { %2317 = vmatprep.subr.bf16.mxu0 %v3736_v12 }
 0x10e   :  { %2248 = vmatpush1.bf16.msra.mxu1 %v3779_v49  ;;  %v3800_v49 = vld [vmem:[%s4519_s3 + $0x2d8] ss:$20 sps:$4 sm:$0xff]  }
 0x10f   :  { %2260 = vmatprep.subr.bf16.mxu1 %v3787_v54  ;;  %v3806_v54 = vld [vmem:[%s4519_s3 + $0x300] ss:$20 sps:$4 sm:$0xff]  }
 0x110   :  { %2318 = vmatpush1.bf16.msra.mxu0 %v3734_v15 }
 0x111   :  { %2319 = vmatprep.subr.bf16.mxu0 %v3742_v16 }
 0x114   :  { %2320 = vmatpush1.bf16.msra.mxu0 %v3740_v19 }
 0x115   :  { %2321 = vmatprep.subr.bf16.mxu0 %v3748_v20 }
 0x118   :  { %2322 = vmatpush1.bf16.msra.mxu0 %v3746_v23  ;;  %v277_v23 = vrot.slane %v272_v53, %v276_v21 }
 0x119   :  { %2323 = vmatprep.subr.bf16.mxu0 %v3754_v24  ;;  %v281_v24 = vrot.slane %v272_v53, %v280_v22  ;;  %v3803_v53 = vld [vmem:[%s4519_s3 + $0x2f8] ss:$20 sps:$4 sm:$0xff]  }
 0x11c   :  { %2324 = vmatpush1.bf16.msra.mxu0 %v3752_v27 }
 0x11d   :  { %2325 = vmatprep.subr.bf16.mxu0 %v3760_v28 }
 0x120   :  { %2326 = vmatpush1.bf16.msra.mxu0 %v3758_v30 }
 0x121   :  { %2327 = vmatprep.subr.bf16.mxu0 %v3766_v31 }
 0x122   :  { %v3270_v35 = vpop.f32.mrb[0].mxu1 }
 0x123   :  { %v3271_v36 = vpop.f32.mrb[1].mxu1 }
 0x124   :  { %2328 = vmatpush1.bf16.msra.mxu0 %v3764_v32  ;;  %v3272_v37 = vadd.f32 %v3271_v36, %v3270_v35  ;;  %v3273_v38 = vpop.f32.mrb[2].mxu1 }
 0x125   :  { %2329 = vmatprep.subr.bf16.mxu0 %v3772_v33  ;;  %v3274_v39 = vpop.f32.mrb[3].mxu1 }
 0x126   :  { %v3275_v40 = vadd.f32 %v3274_v39, %v3273_v38  ;;  %v1284_v57 = vadd.f32 %v3272_v37, %v285_v56  ;;  %v3785_v39 = vld [vmem:[%s4519_s3 + $0x280] ss:$20 sps:$4 sm:$0xff]  }
 0x128   :  { %2330 = vmatpush1.bf16.msra.mxu0 %v3770_v34  ;;  %v1287_v60 = vadd.f32 %v3275_v40, %v285_v56  ;;  %v3788_v40 = vld [vmem:[%s4519_s3 + $0x288] ss:$20 sps:$4 sm:$0xff]   ;;  %v3814_v56 = vld [vmem:[%s4519_s3 + $0x32c] ss:$20 sps:$4 sm:$0xff]  }
 0x129   :  { %2331 = vmatprep.subr.bf16.mxu0 %v3778_v43  ;;  %v3791_v43 = vld [vmem:[%s4519_s3 + $0x2a8] ss:$20 sps:$4 sm:$0xff]  }
 0x12c   :  { %2332 = vmatpush1.bf16.msra.mxu0 %v3776_v45  ;;  %v3799_v45 = vld [vmem:[%s4519_s3 + $0x2d4] ss:$20 sps:$4 sm:$0xff]  }
 0x12d   :  { %2333 = vmatprep.subr.bf16.mxu0 %v3784_v48  ;;  %v3797_v48 = vld [vmem:[%s4519_s3 + $0x2d0] ss:$20 sps:$4 sm:$0xff]  }
 0x130   :  { %2334 = vmatpush1.bf16.msra.mxu0 %v3782_v50  ;;  %v3805_v50 = vld [vmem:[%s4519_s3 + $0x2fc] ss:$20 sps:$4 sm:$0xff]  }
 0x131   :  { %2346 = vmatprep.subr.bf16.mxu0 %v3790_v55  ;;  %v3811_v55 = vld [vmem:[%s4519_s3 + $0x324] ss:$20 sps:$4 sm:$0xff]  }
 0x143   :  { %v3292_v58 = vpop.f32.mrb[4].mxu1 }
 0x144   :  { %v3293_v59 = vpop.f32.mrb[5].mxu1 }
 0x145   :  { %v3294_v61 = vadd.f32 %v3293_v59, %v3292_v58  ;;  %v3295_v62 = vpop.f32.mrb[6].mxu1  ;;  %v3812_v58 = vld [vmem:[%s4519_s3 + $0x328] ss:$20 sps:$4 sm:$0xff]   ;;  %v3817_v59 = vld [vmem:[%s4519_s3 + $0x34c] ss:$20 sps:$4 sm:$0xff]  }
 0x146   :  { %v3296_v63 = vpop.f32.mrb[7].mxu1 }
 0x147   :  { %v1325_v0 = vadd.f32 %v3294_v61, %v1284_v57  ;;  %v3297_v1 = vadd.f32 %v3296_v63, %v3295_v62  ;;  %v3809_v57 = vld [vmem:[%s4519_s3 + $0x320] ss:$20 sps:$4 sm:$0xff]   ;;  %v3815_v61 = vld [vmem:[%s4519_s3 + $0x348] ss:$20 sps:$4 sm:$0xff]   ;;  %v3818_v62 = vld [vmem:[%s4519_s3 + $0x350] ss:$20 sps:$4 sm:$0xff]  }
 0x148   :  { %v3823_v63 = vld [vmem:[%s4519_s3 + $0x374] ss:$20 sps:$4 sm:$0xff]  }
 0x149   :  { %v1328_v3 = vadd.f32 %v3297_v1, %v1287_v60  ;;  %v3820_v60 = vld [vmem:[%s4519_s3 + $0x354] ss:$20 sps:$4 sm:$0xff]   ;;  %v3821_v1 = vld [vmem:[%s4519_s3 + $0x370] ss:$20 sps:$4 sm:$0xff]  }
 0x163   :  { %v3314_v4 = vpop.f32.mrb[8].mxu1 }
 0x164   :  { %v3315_v5 = vpop.f32.mrb[9].mxu1 }
 0x165   :  { %v3316_v6 = vadd.f32 %v3315_v5, %v3314_v4  ;;  %v3317_v7 = vpop.f32.mrb[10].mxu1  ;;  %v3829_v4 = vld [vmem:[%s4519_s3 + $0x39c] ss:$20 sps:$4 sm:$0xff]   ;;  %v3832_v5 = vld [vmem:[%s4519_s3 + $0x3a4] ss:$20 sps:$4 sm:$0xff]  }
 0x166   :  { %v3318_v8 = vpop.f32.mrb[11].mxu1 }
 0x167   :  { %v3319_v9 = vadd.f32 %v3318_v8, %v3317_v7  ;;  %v1366_v10 = vadd.f32 %v3316_v6, %v1325_v0  ;;  %v3826_v0 = vld [vmem:[%s4519_s3 + $0x37c] ss:$20 sps:$4 sm:$0xff]   ;;  %v3827_v6 = vld [vmem:[%s4519_s3 + $0x398] ss:$20 sps:$4 sm:$0xff]   ;;  %v3830_v7 = vld [vmem:[%s4519_s3 + $0x3a0] ss:$20 sps:$4 sm:$0xff]  }
 0x168   :  { %v3833_v8 = vld [vmem:[%s4519_s3 + $0x150] ss:$20 sps:$4 sm:$0xff]  }
 0x169   :  { %v1369_v11 = vadd.f32 %v3319_v9, %v1328_v3  ;;  %v3824_v3 = vld [vmem:[%s4519_s3 + $0x378] ss:$20 sps:$4 sm:$0xff]  }
 0x16a   :  { %v3858_v9 = vld [vmem:[#allocation4 + $0xc0] sm:$0xff]  }
 0x16b   :  { %v1406_v12 = vpop.f32.mrb[12].mxu1 }
 0x16c   :  { %v1407_v13 = vadd.f32 %v1406_v12, %v1366_v10  ;;  %v3410_v14 = vpop.f32.mrb[13].mxu1  ;;  %v3834_v10 = vld [vmem:[%s4519_s3 + $0x10] ss:$20 sps:$4 sm:$0xff]   ;;  %v3860_v12 = vld [vmem:[#allocation4 + $0x80] sm:$0xff]  }
 0x16d   :  { %v1409_v15 = vpop.f32.mrb[14].mxu1  ;;  %v3836_v14 = vld [vmem:[%s4519_s3 + $0x38] ss:$20 sps:$4 sm:$0xff]  }
 0x16e   :  { %v1415_v16 = vmax.f32 %v1407_v13, 0.0  ;;  %v1410_v17 = vadd.f32 %v1409_v15, %v1369_v11  ;;  %v3411_v18 = vpop.f32.mrb[15].mxu1  ;;  %v3835_v11 = vld [vmem:[%s4519_s3 + $0x178] ss:$20 sps:$4 sm:$0xff]   ;;  %v3862_v13 = vld [vmem:[#allocation4 + $0xc8] sm:$0xff]  }
 0x16f   :  { %v3837_v15 = vld [vmem:[%s4519_s3 + $0x1a0] ss:$20 sps:$4 sm:$0xff]  }
 0x170   :  { %v1418_v19 = vmax.f32 %v1410_v17, 0.0  ;;  %v3866_v17 = vld [vmem:[#allocation4 + $0xd0] sm:$0xff]   ;;  %v3838_v18 = vld [vmem:[%s4519_s3 + $0x60] ss:$20 sps:$4 sm:$0xff]  }
 0x172   :  { %v4284_v20 = vpack.c.bf16 %v1418_v19, %v1415_v16  ;;  %v3864_v16 = vld [vmem:[#allocation4 + $0x88] sm:$0xff]   ;;  %v3839_v19 = vld [vmem:[%s4519_s3 + $0x1c8] ss:$20 sps:$4 sm:$0xff]  }
 0x1c6   :  { %v1240_v25 = vpop.f32.mrb[0].mxu0 }
 0x1c7   :  { %v3452_v26 = vadd.f32 %v1240_v25, %v277_v23  ;;  %v1242_v27 = vpop.f32.mrb[1].mxu0  ;;  %v3840_v25 = vld [vmem:[%s4519_s3 + $0x88] ss:$20 sps:$4 sm:$0xff]  }
 0x1c8   :  { %v3453_v28 = vadd.f32 %v1242_v27, %v281_v24  ;;  %v1244_v29 = vpop.f32.mrb[2].mxu0  ;;  %v3872_v27 = vld [vmem:[#allocation4 + $0x98] sm:$0xff]  }
 0x1c9   :  { %v3454_v30 = vadd.f32 %v1244_v29, %v277_v23  ;;  %v1246_v31 = vpop.f32.mrb[3].mxu0  ;;  %v1413_v33 = vmax.f32 %v3452_v26, 0.0  ;;  %v3868_v23 = vld [vmem:[#allocation4 + $0x90] sm:$0xff]   ;;  %v3841_v26 = vld [vmem:[%s4519_s3 + $0x1f0] ss:$20 sps:$4 sm:$0xff]  }
 0x1ca   :  { %v3455_v32 = vadd.f32 %v1246_v31, %v281_v24  ;;  %v1414_v35 = vmax.f32 %v3453_v28, 0.0  ;;  %v3870_v24 = vld [vmem:[#allocation4 + $0xd8] sm:$0xff]   ;;  %v3874_v28 = vld [vmem:[#allocation4 + $0xe0] sm:$0xff]  }
 0x1cb   :  { %v1416_v34 = vmax.f32 %v3454_v30, 0.0  ;;  %v3842_v29 = vld [vmem:[%s4519_s3 + $0xb0] ss:$20 sps:$4 sm:$0xff]   ;;  %v3843_v30 = vld [vmem:[%s4519_s3 + $0x218] ss:$20 sps:$4 sm:$0xff]  }
 0x1cc   :  { %v1417_v36 = vmax.f32 %v3455_v32, 0.0  ;;  %v3876_v31 = vld [vmem:[#allocation4 + $0xa0] sm:$0xff]   ;;  %v3878_v32 = vld [vmem:[#allocation4 + $0xe8] sm:$0xff]  }
 0x1cd   :  { %v4292_v37 = vpack.c.bf16 %v1416_v34, %v1413_v33  ;;  %v3844_v33 = vld [vmem:[%s4519_s3 + $0xd8] ss:$20 sps:$4 sm:$0xff]   ;;  %v3845_v34 = vld [vmem:[%s4519_s3 + $0x240] ss:$20 sps:$4 sm:$0xff]  }
 0x1ce   :  { %v4294_v38 = vpack.c.bf16 %v1417_v36, %v1414_v35  ;;  %v3846_v35 = vld [vmem:[%s4519_s3 + $0x100] ss:$20 sps:$4 sm:$0xff]   ;;  %v3847_v36 = vld [vmem:[%s4519_s3 + $0x268] ss:$20 sps:$4 sm:$0xff]  }
 0x1d0   :  { %2249 = vmatprep.mubr.bf16.mxu1 %v4294_v38  ;;  %2335 = vmatprep.mubr.bf16.mxu0 %v4294_v38 }
 0x1d1   :  { %2250 = vmatmul.mubr.bf16.vlgmr.msra.gmra.mrb[16].mxu1 %v4292_v37  ;;  %2336 = vmatmul.mubr.bf16.vlgmr.msra.gmra.mrb[4].mxu0 %v4292_v37 }
 0x1d2   :  { %2261 = vmatpush1.bf16.msra.mxu1 %v3785_v39  ;;  %2347 = vmatpush1.bf16.msra.mxu0 %v3788_v40  ;;  %v3849_v39 = vld [vmem:[%s4519_s3 + $0x290] ss:$20 sps:$4 sm:$0xff]   ;;  %v3850_v40 = vld [vmem:[%s4519_s3 + $0x2b8] ss:$20 sps:$4 sm:$0xff]  }
 0x1d3   :  { %2262 = vmatprep.subr.bf16.mxu1 %v3793_v41  ;;  %2348 = vmatprep.subr.bf16.mxu0 %v3796_v42  ;;  %v3851_v41 = vld [vmem:[%s4519_s3 + $0x2e0] ss:$20 sps:$4 sm:$0xff]   ;;  %v3853_v42 = vld [vmem:[%s4519_s3 + $0x330] ss:$20 sps:$4 sm:$0xff]  }
 0x1d4   :  { %2292 = vmatprep.mubr.bf16.mxu1 %v3953_v52  ;;  %2378 = vmatprep.mubr.bf16.mxu0 %v3953_v52  ;;  %v3808_v52 = vld [vmem:[%s4519_s3 + $0x304] ss:$20 sps:$4 sm:$0xff]  }
 0x1d6   :  { %2263 = vmatpush1.bf16.msra.mxu1 %v3791_v43  ;;  %2349 = vmatpush1.bf16.msra.mxu0 %v3794_v44  ;;  %v3854_v43 = vld [vmem:[%s4519_s3 + $0x358] ss:$20 sps:$4 sm:$0xff]   ;;  %v3855_v44 = vld [vmem:[%s4519_s3 + $0x380] ss:$20 sps:$4 sm:$0xff]  }
 0x1d7   :  { %2264 = vmatprep.subr.bf16.mxu1 %v3799_v45  ;;  %2350 = vmatprep.subr.bf16.mxu0 %v3802_v47  ;;  %v3856_v45 = vld [vmem:[%s4519_s3 + $0x3a8] ss:$20 sps:$4 sm:$0xff]  }
 0x1d8   :  { %v3857_v47 = vld [vmem:[#allocation4 + $0x40] sm:$0xff]  }
 0x1da   :  { %2265 = vmatpush1.bf16.msra.mxu1 %v3797_v48  ;;  %2351 = vmatpush1.bf16.msra.mxu0 %v3800_v49  ;;  %v3859_v48 = vld [vmem:[#allocation4] sm:$0xff]   ;;  %v3861_v49 = vld [vmem:[#allocation4 + $0x48] sm:$0xff]  }
 0x1db   :  { %2266 = vmatprep.subr.bf16.mxu1 %v3805_v50  ;;  %2352 = vmatprep.subr.bf16.mxu0 %v3808_v52  ;;  %v3863_v50 = vld [vmem:[#allocation4 + $0x8] sm:$0xff]   ;;  %v3865_v52 = vld [vmem:[#allocation4 + $0x50] sm:$0xff]  }
 0x1de   :  { %2267 = vmatpush1.bf16.msra.mxu1 %v3803_v53  ;;  %2353 = vmatpush1.bf16.msra.mxu0 %v3806_v54  ;;  %v3867_v53 = vld [vmem:[#allocation4 + $0x10] sm:$0xff]   ;;  %v3869_v54 = vld [vmem:[#allocation4 + $0x58] sm:$0xff]  }
 0x1df   :  { %2268 = vmatprep.subr.bf16.mxu1 %v3811_v55  ;;  %2354 = vmatprep.subr.bf16.mxu0 %v3814_v56  ;;  %v3871_v55 = vld [vmem:[#allocation4 + $0x18] sm:$0xff]   ;;  %v3873_v56 = vld [vmem:[#allocation4 + $0x60] sm:$0xff]  }
 0x1e2   :  { %2269 = vmatpush1.bf16.msra.mxu1 %v3809_v57  ;;  %2355 = vmatpush1.bf16.msra.mxu0 %v3812_v58  ;;  %v3875_v57 = vld [vmem:[#allocation4 + $0x20] sm:$0xff]   ;;  %v3877_v58 = vld [vmem:[#allocation4 + $0x68] sm:$0xff]  }
 0x1e3   :  { %2270 = vmatprep.subr.bf16.mxu1 %v3817_v59  ;;  %2356 = vmatprep.subr.bf16.mxu0 %v3820_v60  ;;  %v3879_v59 = vld [vmem:[#allocation4 + $0x28] sm:$0xff]  }
 0x1e4   :  { %v3880_v60 = vld [vmem:[#allocation4 + $0xa8] sm:$0xff]  }
 0x1e6   :  { %2271 = vmatpush1.bf16.msra.mxu1 %v3815_v61  ;;  %2357 = vmatpush1.bf16.msra.mxu0 %v3818_v62  ;;  %v3882_v61 = vld [vmem:[#allocation4 + $0xf0] sm:$0xff]  }
 0x1e7   :  { %2272 = vmatprep.subr.bf16.mxu1 %v3823_v63  ;;  %2358 = vmatprep.subr.bf16.mxu0 %v3826_v0  ;;  %v3883_v62 = vld [vmem:[#allocation4 + $0x30] sm:$0xff]   ;;  %v3885_v0 = vld [vmem:[#allocation4 + $0x78] sm:$0xff]  }
 0x1e8   :  { %v3884_v63 = vld [vmem:[#allocation4 + $0xb0] sm:$0xff]  }
 0x1ea   :  { %2273 = vmatpush1.bf16.msra.mxu1 %v3821_v1  ;;  %2359 = vmatpush1.bf16.msra.mxu0 %v3824_v3  ;;  %v3886_v1 = vld [vmem:[#allocation4 + $0xf8] sm:$0xff]  }
 0x1eb   :  { %2274 = vmatprep.subr.bf16.mxu1 %v3829_v4  ;;  %2360 = vmatprep.subr.bf16.mxu0 %v3832_v5  ;;  %v3887_v3 = vld [vmem:[#allocation4 + $0x38] sm:$0xff]   ;;  %v4483_v5 = vld [vmem:[%s4520_s4] sm:$0x1f] }
 0x1ec   :  { %v3888_v4 = vld [vmem:[#allocation4 + $0xb8] sm:$0xff]  }
 0x1ee   :  { %2275 = vmatpush1.bf16.msra.mxu1 %v3827_v6  ;;  %2361 = vmatpush1.bf16.msra.mxu0 %v3830_v7  ;;  %v1582_v6 = vsub.s32 3, %v4258_v46  ;;  %v1571_v7 = vrot.slane %v4483_v5, %v276_v21 }
 0x1ef   :  { %3322 = vmatprep.subr.bf16.mxu1 %v3833_v8  ;;  %3375 = vmatprep.subr.bf16.mxu0 %v3858_v9  ;;  %v1579_v8 = vrot.slane %v4483_v5, %v284_v51  ;;  %v1575_v9 = vrot.slane %v4483_v5, %v280_v22 }
 0x1f1   :  { %2293 = vmatmul.mubr.bf16.vlgmr.msra.gmra.mrb[16].mxu1 %v4284_v20  ;;  %2379 = vmatmul.mubr.bf16.vlgmr.msra.gmra.mrb[4].mxu0 %v4284_v20 }
 0x1f2   :  { %3323 = vmatpush3.bf16.msra.mxu1 %v3834_v10  ;;  %2421 = vmatprep.mubr.bf16.mxu1 %v4294_v38  ;;  %v3848_v38 = vld [vmem:[%s4519_s3 + $0x128] ss:$20 sps:$4 sm:$0xff]   ;;  %v1583_v10 = vrot.slane %v4483_v5, %v1582_v6 }
 0x1f3   :  { %3324 = vmatprep.subr.bf16.mxu1 %v3835_v11  ;;  %3376 = vmatpush3.bf16.msra.mxu0 %v3860_v12 }
 0x1f4   :  { %3377 = vmatprep.subr.bf16.mxu0 %v3862_v13 }
 0x1f6   :  { %3325 = vmatpush3.bf16.msra.mxu1 %v3836_v14 }
 0x1f7   :  { %3326 = vmatprep.subr.bf16.mxu1 %v3837_v15  ;;  %3378 = vmatpush3.bf16.msra.mxu0 %v3864_v16 }
 0x1f8   :  { %3379 = vmatprep.subr.bf16.mxu0 %v3866_v17 }
 0x1fa   :  { %3327 = vmatpush3.bf16.msra.mxu1 %v3838_v18 }
 0x1fb   :  { %3328 = vmatprep.subr.bf16.mxu1 %v3839_v19  ;;  %3380 = vmatpush3.bf16.msra.mxu0 %v3868_v23 }
 0x1fc   :  { %3381 = vmatprep.subr.bf16.mxu0 %v3870_v24 }
 0x1fe   :  { %3329 = vmatpush3.bf16.msra.mxu1 %v3840_v25 }
 0x1ff   :  { %3330 = vmatprep.subr.bf16.mxu1 %v3841_v26  ;;  %3382 = vmatpush3.bf16.msra.mxu0 %v3872_v27 }
 0x200   :  { %3383 = vmatprep.subr.bf16.mxu0 %v3874_v28 }
 0x202   :  { %3331 = vmatpush3.bf16.msra.mxu1 %v3842_v29 }
 0x203   :  { %3332 = vmatprep.subr.bf16.mxu1 %v3843_v30  ;;  %3384 = vmatpush3.bf16.msra.mxu0 %v3876_v31 }
 0x204   :  { %3385 = vmatprep.subr.bf16.mxu0 %v3878_v32 }
 0x206   :  { %3333 = vmatpush3.bf16.msra.mxu1 %v3844_v33 }
 0x207   :  { %3334 = vmatprep.subr.bf16.mxu1 %v3845_v34  ;;  %3386 = vmatpush3.bf16.msra.mxu0 %v3880_v60 }
 0x208   :  { %3387 = vmatprep.subr.bf16.mxu0 %v3882_v61 }
 0x20a   :  { %3335 = vmatpush3.bf16.msra.mxu1 %v3846_v35 }
 0x20b   :  { %3336 = vmatprep.subr.bf16.mxu1 %v3847_v36  ;;  %3388 = vmatpush3.bf16.msra.mxu0 %v3884_v63 }
 0x20c   :  { %3389 = vmatprep.subr.bf16.mxu0 %v3886_v1 }
 0x20e   :  { %3337 = vmatpush3.bf16.msra.mxu1 %v3848_v38 }
 0x20f   :  { %3412 = vmatprep.subr.bf16.mxu1 %v3951_v2  ;;  %3390 = vmatpush3.bf16.msra.mxu0 %v3888_v4 }
 0x211   :  { %2422 = vmatmul.mubr.bf16.vlgmr.msra.gmra.mrb[20].mxu1 %v4292_v37  ;;  %v3852_v37 = vld [vmem:[%s4519_s3 + $0x308] ss:$20 sps:$4 sm:$0xff]  }
 0x212   :  { %3413 = vmatpush3.bf16.msra.mxu1 %v3849_v39  ;;  %3428 = vmatprep.mubr.msk.bf16.mxu1 %vm3952_vm0, %v3951_v2 }
 0x213   :  { %3414 = vmatprep.subr.bf16.mxu1 %v3951_v2 }
 0x216   :  { %3415 = vmatpush3.bf16.msra.mxu1 %v3850_v40  ;;  %v3889_v40 = vld [vmem:[#allocation4 + $0x100] sm:$0xff]  }
 0x217   :  { %3416 = vmatprep.subr.bf16.mxu1 %v3951_v2 }
 0x21a   :  { %3417 = vmatpush3.bf16.msra.mxu1 %v3851_v41  ;;  %v3890_v41 = vld [vmem:[#allocation4 + $0x108] sm:$0xff]  }
 0x21b   :  { %3418 = vmatprep.subr.bf16.mxu1 %v3951_v2 }
 0x21e   :  { %3419 = vmatpush3.bf16.msra.mxu1 %v3852_v37  ;;  %v3891_v37 = vld [vmem:[#allocation4 + $0x110] sm:$0xff]  }
 0x21f   :  { %3420 = vmatprep.subr.bf16.mxu1 %v3951_v2 }
 0x222   :  { %3421 = vmatpush3.bf16.msra.mxu1 %v3853_v42  ;;  %v3892_v42 = vld [vmem:[#allocation4 + $0x118] sm:$0xff]  }
 0x223   :  { %3422 = vmatprep.subr.bf16.mxu1 %v3951_v2 }
 0x226   :  { %3423 = vmatpush3.bf16.msra.mxu1 %v3854_v43  ;;  %v3893_v43 = vld [vmem:[#allocation4 + $0x120] sm:$0xff]  }
 0x227   :  { %3424 = vmatprep.subr.bf16.mxu1 %v3951_v2 }
 0x22a   :  { %3425 = vmatpush3.bf16.msra.mxu1 %v3855_v44  ;;  %v3894_v44 = vld [vmem:[#allocation4 + $0x128] sm:$0xff]  }
 0x22b   :  { %3426 = vmatprep.subr.bf16.mxu1 %v3951_v2 }
 0x22e   :  { %3427 = vmatpush3.bf16.msra.mxu1 %v3856_v45 }
 0x22f   :  { %3353 = vmatprep.subr.bf16.mxu1 %v3857_v47  ;;  %v3895_v47 = vld [vmem:[#allocation4 + $0x130] sm:$0xff]  }
 0x231   :  { %3429 = vmatmul.mubr.bf16.vlgmr.msra.gmra.mrb[24].mxu1 %v4284_v20  ;;  %v3881_v20 = vld [vmem:[#allocation4 + $0x70] sm:$0xff]  }
 0x232   :  { %3354 = vmatpush3.bf16.msra.mxu1 %v3859_v48 }
 0x233   :  { %3355 = vmatprep.subr.bf16.mxu1 %v3861_v49 }
 0x236   :  { %3356 = vmatpush3.bf16.msra.mxu1 %v3863_v50 }
 0x237   :  { %3357 = vmatprep.subr.bf16.mxu1 %v3865_v52 }
 0x23a   :  { %3358 = vmatpush3.bf16.msra.mxu1 %v3867_v53 }
 0x23b   :  { %3359 = vmatprep.subr.bf16.mxu1 %v3869_v54  ;;  %v3896_v54 = vld [vmem:[#allocation4 + $0x138] sm:$0xff]  }
 0x23e   :  { %3360 = vmatpush3.bf16.msra.mxu1 %v3871_v55  ;;  %v1586_v55 = vsub.s32 4, %v4258_v46 }
 0x23f   :  { %3361 = vmatprep.subr.bf16.mxu1 %v3873_v56 }
 0x240   :  { %v1587_v56 = vrot.slane %v4483_v5, %v1586_v55 }
 0x242   :  { %3362 = vmatpush3.bf16.msra.mxu1 %v3875_v57 }
 0x243   :  { %3363 = vmatprep.subr.bf16.mxu1 %v3877_v58 }
 0x246   :  { %3364 = vmatpush3.bf16.msra.mxu1 %v3879_v59 }
 0x247   :  { %3365 = vmatprep.subr.bf16.mxu1 %v3881_v20 }
 0x24a   :  { %3366 = vmatpush3.bf16.msra.mxu1 %v3883_v62 }
 0x24b   :  { %3367 = vmatprep.subr.bf16.mxu1 %v3885_v0 }
 0x24e   :  { %3368 = vmatpush3.bf16.msra.mxu1 %v3887_v3 }
 0x24f   :  { %3432 = vmatprep.subr.bf16.mxu1 %v3951_v2 }
 0x2c4   :  { %v2294_v11 = vpop.f32.mrb[16].mxu1  ;;  %v2380_v12 = vpop.f32.mrb[4].mxu0 }
 0x2c5   :  { %v3456_v13 = vadd.f32 %v2294_v11, %v1571_v7  ;;  %v3460_v14 = vadd.f32 %v2380_v12, %v1579_v8  ;;  %v2296_v15 = vpop.f32.mrb[17].mxu1  ;;  %v2382_v16 = vpop.f32.mrb[5].mxu0 }
 0x2c6   :  { %v3457_v17 = vadd.f32 %v2296_v15, %v1575_v9  ;;  %v3461_v18 = vadd.f32 %v2382_v16, %v1583_v10  ;;  %v2298_v19 = vpop.f32.mrb[18].mxu1  ;;  %v2384_v21 = vpop.f32.mrb[6].mxu0 }
 0x2c7   :  { %v3458_v23 = vadd.f32 %v2298_v19, %v1571_v7  ;;  %v3462_v24 = vadd.f32 %v2384_v21, %v1579_v8  ;;  %v2300_v25 = vpop.f32.mrb[19].mxu1  ;;  %v2386_v51 = vpop.f32.mrb[7].mxu0  ;;  %v2471_v28 = vmax.f32 %v3456_v13, 0.0  ;;  %v2473_v22 = vmax.f32 %v3460_v14, 0.0 }
 0x2c8   :  { %v3459_v26 = vadd.f32 %v2300_v25, %v1575_v9  ;;  %v3463_v27 = vadd.f32 %v2386_v51, %v1583_v10  ;;  %v2472_v31 = vmax.f32 %v3457_v17, 0.0  ;;  %v2474_v32 = vmax.f32 %v3461_v18, 0.0 }
 0x2c9   :  { %v2476_v29 = vmax.f32 %v3458_v23, 0.0  ;;  %v2478_v30 = vmax.f32 %v3462_v24, 0.0 }
 0x2ca   :  { %v2477_v33 = vmax.f32 %v3459_v26, 0.0  ;;  %v2479_v34 = vmax.f32 %v3463_v27, 0.0 }
 0x2cb   :  { %v2481_v35 = vpack.c.bf16 %v2476_v29, %v2471_v28  ;;  %v2483_v36 = vpack.c.bf16 %v2478_v30, %v2473_v22 }
 0x2cc   :  { %v2482_v38 = vpack.c.bf16 %v2477_v33, %v2472_v31  ;;  %v2484_v39 = vpack.c.bf16 %v2479_v34, %v2474_v32 }
 0x2ce   :  { %2845 = vmatprep.mubr.bf16.mxu1 %v2482_v38  ;;  %2886 = vmatprep.mubr.bf16.mxu0 %v2484_v39 }
 0x2cf   :  { %2846 = vmatmul.mubr.bf16.vlgmr.msra.gmra.mrb[28].mxu1 %v2481_v35  ;;  %2887 = vmatmul.mubr.bf16.vlgmr.msra.gmra.mrb[8].mxu0 %v2483_v36 }
 0x2d0   :  { %3433 = vmatpush3.bf16.msra.mxu1 %v3889_v40  ;;  %3448 = vmatprep.mubr.msk.bf16.mxu1 %vm3952_vm0, %v3951_v2 }
 0x2d1   :  { %3434 = vmatprep.subr.bf16.mxu1 %v3951_v2 }
 0x2d4   :  { %3435 = vmatpush3.bf16.msra.mxu1 %v3890_v41 }
 0x2d5   :  { %3436 = vmatprep.subr.bf16.mxu1 %v3951_v2 }
 0x2d8   :  { %3437 = vmatpush3.bf16.msra.mxu1 %v3891_v37 }
 0x2d9   :  { %3438 = vmatprep.subr.bf16.mxu1 %v3951_v2 }
 0x2dc   :  { %3439 = vmatpush3.bf16.msra.mxu1 %v3892_v42 }
 0x2dd   :  { %3440 = vmatprep.subr.bf16.mxu1 %v3951_v2 }
 0x2e0   :  { %3441 = vmatpush3.bf16.msra.mxu1 %v3893_v43 }
 0x2e1   :  { %3442 = vmatprep.subr.bf16.mxu1 %v3951_v2 }
 0x2e4   :  { %v3338_v45 = vpop.f32.mrb[20].mxu1  ;;  %3443 = vmatpush3.bf16.msra.mxu1 %v3894_v44 }
 0x2e5   :  { %v3339_v48 = vpop.f32.mrb[21].mxu1  ;;  %3444 = vmatprep.subr.bf16.mxu1 %v3951_v2 }
 0x2e6   :  { %v3340_v49 = vadd.f32 %v3339_v48, %v3338_v45  ;;  %v3341_v50 = vpop.f32.mrb[22].mxu1 }
 0x2e7   :  { %v3342_v52 = vpop.f32.mrb[23].mxu1 }
 0x2e8   :  { %v3343_v53 = vadd.f32 %v3342_v52, %v3341_v50  ;;  %3445 = vmatpush3.bf16.msra.mxu1 %v3895_v47  ;;  %v2424_v57 = vadd.f32 %v3340_v49, %v1587_v56 }
 0x2e9   :  { %3446 = vmatprep.subr.bf16.mxu1 %v3951_v2  ;;  %v3213_v2 = vld [vmem:[%s4522_s6] ss:$0 sm:$0xff] }
 0x2ea   :  { %v2427_v20 = vadd.f32 %v3343_v53, %v1587_v56 }
 0x2ec   :  { %3447 = vmatpush3.bf16.msra.mxu1 %v3896_v54 }
 0x304   :  { %v2464_v58 = vpop.f32.mrb[24].mxu1 }
 0x305   :  { %v2465_v59 = vadd.f32 %v2464_v58, %v2424_v57  ;;  %v3430_v60 = vpop.f32.mrb[25].mxu1 }
 0x306   :  { %v2467_v61 = vpop.f32.mrb[26].mxu1 }
 0x307   :  { %v2468_v62 = vadd.f32 %v2467_v61, %v2427_v20  ;;  %v3431_v63 = vpop.f32.mrb[27].mxu1  ;;  %v2475_v0 = vmax.f32 %v2465_v59, 0.0 }
 0x309   :  { %v2480_v1 = vmax.f32 %v2468_v62, 0.0 }
 0x30b   :  { %v2485_v3 = vpack.c.bf16 %v2480_v1, %v2475_v0 }
 0x30d   :  { %3449 = vmatmul.mubr.bf16.vlgmr.msra.gmra.mrb[32].mxu1 %v2485_v3 }
 0x3a2   :  { %v3369_v4 = vpop.f32.mrb[28].mxu1  ;;  %v3391_v6 = vpop.f32.mrb[8].mxu0 }
 0x3a3   :  { %v3370_v46 = vpop.f32.mrb[29].mxu1  ;;  %v3392_v5 = vpop.f32.mrb[9].mxu0 }
 0x3a4   :  { %v3371_v7 = vadd.f32 %v3370_v46, %v3369_v4  ;;  %v3393_v8 = vadd.f32 %v3392_v5, %v3391_v6  ;;  %v3372_v9 = vpop.f32.mrb[30].mxu1  ;;  %v3394_v10 = vpop.f32.mrb[10].mxu0 }
 0x3a5   :  { %v3373_v11 = vpop.f32.mrb[31].mxu1  ;;  %v3395_v12 = vpop.f32.mrb[11].mxu0 }
 0x3a6   :  { %v2848_v13 = vadd.f32 %v3371_v7, %v3213_v2  ;;  %v3374_v14 = vadd.f32 %v3373_v11, %v3372_v9  ;;  %v3396_v15 = vadd.f32 %v3395_v12, %v3394_v10 }
 0x3a8   :  { %v2851_v16 = vadd.f32 %v3374_v14, %v3213_v2  ;;  %v2889_v17 = vadd.f32 %v3393_v8, %v2848_v13 }
 0x3aa   :  { %v2892_v18 = vadd.f32 %v3396_v15, %v2851_v16 }
 0x3e0   :  { %v2929_v19 = vpop.f32.mrb[32].mxu1 }
 0x3e1   :  { %v2930_v21 = vadd.f32 %v2929_v19, %v2889_v17  ;;  %v3450_v23 = vpop.f32.mrb[33].mxu1 }
 0x3e2   :  { %v2932_v24 = vpop.f32.mrb[34].mxu1 }
 0x3e3   :  { %2936 = vst [vmem:[%s4523_s7] sm:$0xff] %v2930_v21  ;;  %v2933_v25 = vadd.f32 %v2932_v24, %v2892_v18  ;;  %v3451_v51 = vpop.f32.mrb[35].mxu1 }
 0x3e5   :  { %2937 = vst [vmem:[%s4523_s7 + $0x8] sm:$0xff] %v2933_v25 }
 0x3e6   :  { %2942 = vsyncpa [#allocation3], 1 }
 0x3e7   :  { %2943 = vsyncpa [#allocation5], 1 }

</bundles_post_ra>
